<compile_context>
chip_gen: v7x
topology: tpu7x:2x2x1
jax: 0.10.0
libtpu: 0.0.40
codegen_flags: <defaults>
</compile_context>

<pallas_src>
import math

import numpy as np
import jax
import jax.numpy as jnp
from jax import lax
from jax.experimental import pallas as pl
from jax.experimental.pallas import tpu as pltpu  # noqa: F401  (TPU backend assumed)

# ----------------------------- config (small, deterministic) -----------------
BATCH = 2
SEQ_LEN = 8            # bert_max_len
HIDDEN = 32            # bert_hidden_units
NUM_HEADS = 2          # bert_num_heads
HEAD_SIZE = 16         # bert_head_size
INNER = NUM_HEADS * HEAD_SIZE          # attention inner dim (== HIDDEN here)
FF_HIDDEN = HIDDEN * 4
NUM_BLOCKS = 2         # bert_num_blocks
NUM_ITEMS = 50
VOCAB = NUM_ITEMS + 1
VOCAB_PAD = 128        # lane-dense padded vocab (shared by gather AND scoring)
LN_EPS = 1e-5
BT = BATCH * SEQ_LEN
SEQ_SHIFT = SEQ_LEN.bit_length() - 1
assert (1 << SEQ_SHIFT) == SEQ_LEN, "SEQ_LEN must be a power of two for the shift trick"

# Row layout of the packed per-layer "small params" slab (NUM_BLOCKS, 8, 128).
ROW_BQKV, ROW_BO, ROW_G1, ROW_BE1, ROW_B1, ROW_B2, ROW_G2, ROW_BE2 = range(8)
N_SMALL_ROWS = 8


def _layer_norm(x, gamma, beta):
    mu = jnp.mean(x, axis=-1, keepdims=True)
    var = jnp.mean((x - mu) ** 2, axis=-1, keepdims=True)
    return (x - mu) * lax.rsqrt(var + LN_EPS) * gamma + beta


# ----------------------------- fused forward kernel --------------------------
def sasrec_fused_kernel(tok_col_ref, tok_row_ref, emb_ref, pos_ref,
                        wqkv_ref, wo_ref, w1_ref, w2_ref, small_ref, out_ref):
    """tokens -> embedding -> NUM_BLOCKS transformer blocks -> scores, one kernel."""
    emb = emb_ref[...]                                        # (VOCAB_PAD, H)

    # ---- embedding: gather as one-hot @ E (single MXU push) + positional add.
    tok_col = tok_col_ref[...]                                # (BT, 1) int32
    vocab_iota = lax.broadcasted_iota(jnp.int32, (BT, VOCAB_PAD), 1)
    onehot = (tok_col == vocab_iota).astype(jnp.float32)      # (BT, VOCAB_PAD)
    pos = jnp.concatenate([pos_ref[...]] * BATCH, axis=0)     # (BT, H)
    x = jnp.dot(onehot, emb, preferred_element_type=jnp.float32) + pos

    # ---- additive attention bias, built in-kernel (block-diagonal + key padding).
    row_b = lax.broadcasted_iota(jnp.int32, (BT, BT), 0) >> SEQ_SHIFT
    col_b = lax.broadcasted_iota(jnp.int32, (BT, BT), 1) >> SEQ_SHIFT
    key_valid = tok_row_ref[...] > 0                          # (1, BT) bool
    bias = jnp.where(jnp.logical_and(row_b == col_b, key_valid),
                     0.0, -1e9).astype(jnp.float32)           # (BT, BT)
    bias2 = jnp.concatenate([bias] * NUM_HEADS, axis=0)       # heads stacked on sublanes

    for blk in range(NUM_BLOCKS):          # unrolled; x stays resident in vregs/VMEM
        wqkv = wqkv_ref[blk]               # (H, 3*INNER); Q cols pre-scaled by 1/sqrt(hs)
        wo = wo_ref[blk]                   # (INNER, H)
        w1 = w1_ref[blk]                   # (H, FF)
        w2 = w2_ref[blk]                   # (FF, H)
        small = small_ref[blk]             # (8, 128) packed biases / LN params
        bqkv = small[ROW_BQKV:ROW_BQKV + 1, :3 * INNER]
        bo = small[ROW_BO:ROW_BO + 1, :HIDDEN]
        g1 = small[ROW_G1:ROW_G1 + 1, :HIDDEN]
        be1 = small[ROW_BE1:ROW_BE1 + 1, :HIDDEN]
        b1 = small[ROW_B1:ROW_B1 + 1, :FF_HIDDEN]
        b2 = small[ROW_B2:ROW_B2 + 1, :HIDDEN]
        g2 = small[ROW_G2:ROW_G2 + 1, :HIDDEN]
        be2 = small[ROW_BE2:ROW_BE2 + 1, :HIDDEN]

        # Fused Q/K/V projection: one (BT,H) x (H,3*INNER) MXU push + one bias add.
        qkv = jnp.dot(x, wqkv, preferred_element_type=jnp.float32) + bqkv

        # Scores for BOTH heads, stacked along sublanes -> one softmax pass.
        s_heads = []
        for h in range(NUM_HEADS):
            lo = h * HEAD_SIZE
            qh = qkv[:, lo:lo + HEAD_SIZE]
            kh = qkv[:, INNER + lo:INNER + lo + HEAD_SIZE]
            # q @ k^T with the transpose folded into the dot_general operand.
            s_heads.append(lax.dot_general(qh, kh, (((1,), (1,)), ((), ())),
                                           preferred_element_type=jnp.float32))
        s = jnp.concatenate(s_heads, axis=0) + bias2          # (NH*BT, BT)
        s = s - jnp.max(s, axis=-1, keepdims=True)
        p = jnp.exp(s)
        p = p * pl.reciprocal(jnp.sum(p, axis=-1, keepdims=True), approx=True)

        # Per-head p@v, lane-concatenated -> ONE (BT,INNER)@(INNER,H) out projection.
        o_heads = []
        for h in range(NUM_HEADS):
            lo = h * HEAD_SIZE
            vh = qkv[:, 2 * INNER + lo:2 * INNER + lo + HEAD_SIZE]
            ph = p[h * BT:(h + 1) * BT, :]
            o_heads.append(jnp.dot(ph, vh, preferred_element_type=jnp.float32))
        o_cat = jnp.concatenate(o_heads, axis=-1)             # (BT, INNER)
        attn = jnp.dot(o_cat, wo, preferred_element_type=jnp.float32) + bo

        h1 = _layer_norm(x + attn, g1, be1)                   # post-LN

        ff = jnp.dot(h1, w1, preferred_element_type=jnp.float32) + b1
        ff = jax.nn.gelu(ff, approximate=True)                # tanh GELU
        ff = jnp.dot(ff, w2, preferred_element_type=jnp.float32) + b2

        x = _layer_norm(h1 + ff, g2, be2)

    # ---- scoring: x @ E^T against the SAME padded embedding (lane-dense 128 store).
    out_ref[...] = lax.dot_general(x, emb, (((1,), (1,)), ((), ())),
                                   preferred_element_type=jnp.float32)


# ----------------------------- parameter init --------------------------------
def init_params(key):
    keys = iter(jax.random.split(key, 64))

    def nrm(shape, scl=0.02):
        return (scl * jax.random.normal(next(keys), shape)).astype(jnp.float32)

    token_emb = nrm((VOCAB, HIDDEN)).at[0].set(0.0)        # padding_idx=0
    pos_emb = nrm((SEQ_LEN, HIDDEN))

    layers = []
    for _ in range(NUM_BLOCKS):
        layers.append(dict(
            wqkv=nrm((HIDDEN, 3 * INNER)), bqkv=nrm((1, 3 * INNER)),   # fused Q|K|V
            wo=nrm((INNER, HIDDEN)), bo=nrm((1, HIDDEN)),
            g1=jnp.ones((1, HIDDEN), jnp.float32), be1=jnp.zeros((1, HIDDEN), jnp.float32),
            w1=nrm((HIDDEN, FF_HIDDEN)), b1=nrm((1, FF_HIDDEN)),
            w2=nrm((FF_HIDDEN, HIDDEN)), b2=nrm((1, HIDDEN)),
            g2=jnp.ones((1, HIDDEN), jnp.float32), be2=jnp.zeros((1, HIDDEN), jnp.float32),
        ))
    return token_emb, pos_emb, layers


# ----------------------------- one-time packing (outside jit) -----------------
def _pad_row(v, width=128):
    v = jnp.asarray(v, jnp.float32).reshape(1, -1)
    return jnp.pad(v, ((0, 0), (0, width - v.shape[1])))


def pack_params(token_emb, pos_emb, layers):
    """Collapse per-layer params into a few packed slabs (done once, outside jit)."""
    scale = 1.0 / math.sqrt(HEAD_SIZE)
    wqkv_l, wo_l, w1_l, w2_l, small_l = [], [], [], [], []
    for p in layers:
        wqkv = p["wqkv"].at[:, :INNER].multiply(scale)   # fold 1/sqrt(hs) into Q proj
        bqkv = p["bqkv"].at[:, :INNER].multiply(scale)
        wqkv_l.append(wqkv)
        wo_l.append(p["wo"])
        w1_l.append(p["w1"])
        w2_l.append(p["w2"])
        rows = [bqkv, p["bo"], p["g1"], p["be1"], p["b1"], p["b2"], p["g2"], p["be2"]]
        small_l.append(jnp.concatenate([_pad_row(r) for r in rows], axis=0))
    emb_pad = jnp.zeros((VOCAB_PAD, HIDDEN), jnp.float32).at[:VOCAB].set(token_emb)
    return dict(
        emb_pad=emb_pad,                      # shared by in-kernel gather AND scoring
        pos=pos_emb.astype(jnp.float32),      # (SEQ_LEN, H)
        wqkv=jnp.stack(wqkv_l),               # (NUM_BLOCKS, H, 3*INNER)
        wo=jnp.stack(wo_l),                   # (NUM_BLOCKS, INNER, H)
        w1=jnp.stack(w1_l),                   # (NUM_BLOCKS, H, FF)
        w2=jnp.stack(w2_l),                   # (NUM_BLOCKS, FF, H)
        small=jnp.stack(small_l),             # (NUM_BLOCKS, 8, 128)
    )


# ----------------------------- full forward -----------------------------------
def _cost_estimate():
    per_block = (2 * BT * HIDDEN * 3 * INNER                  # fused QKV
                 + 2 * NUM_HEADS * 2 * BT * BT * HEAD_SIZE    # q@k^T and p@v
                 + 2 * BT * INNER * HIDDEN                    # output proj
                 + 2 * 2 * BT * HIDDEN * FF_HIDDEN)           # FF up + down
    flops = NUM_BLOCKS * per_block + 2 * 2 * BT * VOCAB_PAD * HIDDEN  # embed + scoring
    transcendentals = NUM_BLOCKS * (NUM_HEADS * BT * BT + BT * FF_HIDDEN)
    bytes_accessed = 4 * (2 * BT                              # both token layouts
                          + VOCAB_PAD * HIDDEN + SEQ_LEN * HIDDEN
                          + NUM_BLOCKS * (HIDDEN * 3 * INNER + INNER * HIDDEN
                                          + 2 * HIDDEN * FF_HIDDEN
                                          + N_SMALL_ROWS * 128)
                          + BT * VOCAB_PAD)                   # output
    return pl.CostEstimate(flops=flops, transcendentals=transcendentals,
                           bytes_accessed=bytes_accessed)


def sasrec_forward(tokens, packed):
    B, T = tokens.shape
    tok_col = tokens.reshape(B * T, 1).astype(jnp.int32)    # for the one-hot gather
    tok_row = tokens.reshape(1, B * T).astype(jnp.int32)    # for the key-padding bias
    scores_pad = pl.pallas_call(
        sasrec_fused_kernel,
        out_shape=jax.ShapeDtypeStruct((B * T, VOCAB_PAD), jnp.float32),
        cost_estimate=_cost_estimate(),
    )(tok_col, tok_row, packed["emb_pad"], packed["pos"],
      packed["wqkv"], packed["wo"], packed["w1"], packed["w2"], packed["small"])
    return scores_pad[:, :VOCAB].reshape(B, T, VOCAB)


# ----------------------------- pure-JAX reference -----------------------------
def sasrec_reference(tokens, token_emb, pos_emb, layers):
    """Reference with exact softmax, for a tolerance check against the kernel."""
    B, T = tokens.shape
    x = (jnp.take(token_emb, tokens, axis=0) + pos_emb[None]).reshape(B * T, HIDDEN)
    key_valid = (tokens > 0).reshape(1, B * T)
    rb = np.arange(B * T)[:, None] // T
    cb = np.arange(B * T)[None, :] // T
    bias = jnp.where(jnp.asarray(rb == cb) & key_valid, 0.0, -1e9).astype(jnp.float32)
    scale = 1.0 / math.sqrt(HEAD_SIZE)
    for p in layers:
        qkv = x @ p["wqkv"] + p["bqkv"]
        attn = jnp.zeros((B * T, HIDDEN), jnp.float32)
        for h in range(NUM_HEADS):
            lo = h * HEAD_SIZE
            qh = qkv[:, lo:lo + HEAD_SIZE]
            kh = qkv[:, INNER + lo:INNER + lo + HEAD_SIZE]
            vh = qkv[:, 2 * INNER + lo:2 * INNER + lo + HEAD_SIZE]
            a = jax.nn.softmax(qh @ kh.T * scale + bias, axis=-1)
            attn = attn + (a @ vh) @ p["wo"][lo:lo + HEAD_SIZE, :]
        attn = attn + p["bo"]
        h1 = _layer_norm(x + attn, p["g1"], p["be1"])
        ff = jax.nn.gelu(h1 @ p["w1"] + p["b1"], approximate=True)
        ff = ff @ p["w2"] + p["b2"]
        x = _layer_norm(h1 + ff, p["g2"], p["be2"])
    return (x @ token_emb.T).reshape(B, T, VOCAB)


if __name__ == "__main__":
    key = jax.random.PRNGKey(0)
    k_param, k_tok = jax.random.split(key)

    token_emb, pos_emb, layers = init_params(k_param)
    packed = pack_params(token_emb, pos_emb, layers)          # one-time packing

    tokens = jax.random.randint(k_tok, (BATCH, SEQ_LEN), 1, VOCAB, dtype=jnp.int32)
    tokens = tokens.at[0, :2].set(0)   # include padding to exercise the mask
    tokens = tokens.at[1, 0].set(0)

    fwd = jax.jit(sasrec_forward)
    scores = fwd(tokens, packed)
    jax.block_until_ready(scores)

    assert scores.shape == (BATCH, SEQ_LEN, VOCAB)
    assert bool(jnp.all(jnp.isfinite(scores)))

    # Tolerance check vs. exact-softmax reference (approx reciprocal / MXU bf16
    # truncation give ~1e-3-level relative differences).
    ref = sasrec_reference(tokens, token_emb, pos_emb, layers)
    assert bool(jnp.allclose(scores, ref, atol=5e-2, rtol=5e-2)), \
        f"max abs diff {float(jnp.max(jnp.abs(scores - ref)))}"

    print("KERNEL_OK")
</pallas_src>

<mosaic_0001>
module attributes {stable_mosaic.version = 11 : i64} {
  func.func @sasrec_fused_kernel(%arg0: memref<16x1xi32, #tpu.memory_space<vmem>>, %arg1: memref<1x16xi32, #tpu.memory_space<vmem>>, %arg2: memref<128x32xf32, #tpu.memory_space<vmem>>, %arg3: memref<8x32xf32, #tpu.memory_space<vmem>>, %arg4: memref<2x32x96xf32, #tpu.memory_space<vmem>>, %arg5: memref<2x32x32xf32, #tpu.memory_space<vmem>>, %arg6: memref<2x32x128xf32, #tpu.memory_space<vmem>>, %arg7: memref<2x128x32xf32, #tpu.memory_space<vmem>>, %arg8: memref<2x8x128xf32, #tpu.memory_space<vmem>>, %arg9: memref<16x128xf32, #tpu.memory_space<vmem>>) attributes {dimension_semantics = [], scalar_prefetch = 0 : i64, scratch_operands = 0 : i64, tpu.core_type = #tpu.core_type<tc>} {
    %c0 = arith.constant 0 : index
    %c0_0 = arith.constant 0 : index
    %0 = vector.load %arg2[%c0, %c0_0] : memref<128x32xf32, #tpu.memory_space<vmem>>, vector<128x32xf32>
    %c0_1 = arith.constant 0 : index
    %c0_2 = arith.constant 0 : index
    %1 = vector.load %arg0[%c0_1, %c0_2] : memref<16x1xi32, #tpu.memory_space<vmem>>, vector<16x1xi32>
    %2 = tpu.iota {dimensions = array<i32: 1>} : vector<16x128xi32>
    %3 = vector.broadcast %1 : vector<16x1xi32> to vector<16x128xi32>
    %4 = arith.cmpi eq, %3, %2 : vector<16x128xi32>
    %5 = arith.extui %4 : vector<16x128xi1> to vector<16x128xi32>
    %6 = arith.sitofp %5 : vector<16x128xi32> to vector<16x128xf32>
    %c0_3 = arith.constant 0 : index
    %c0_4 = arith.constant 0 : index
    %7 = vector.load %arg3[%c0_3, %c0_4] : memref<8x32xf32, #tpu.memory_space<vmem>>, vector<8x32xf32>
    %8 = tpu.concatenate %7, %7 in 0 : vector<8x32xf32>, vector<8x32xf32> -> vector<16x32xf32>
    %cst = arith.constant dense<0.000000e+00> : vector<16x32xf32>
    %9 = tpu.matmul %6, %0, %cst {dimension_numbers = #tpu.dot_dimension_numbers<[1], [0], [0], [1], [0, 0, 1, 1], [], []>} : vector<16x128xf32>, vector<128x32xf32>, vector<16x32xf32> -> vector<16x32xf32>
    %10 = arith.addf %9, %8 : vector<16x32xf32>
    %11 = tpu.iota {dimensions = array<i32: 0>} : vector<16x16xi32>
    %c3_i32 = arith.constant 3 : i32
    %12 = vector.broadcast %c3_i32 : i32 to vector<16x16xi32>
    %13 = arith.shrsi %11, %12 : vector<16x16xi32>
    %14 = tpu.iota {dimensions = array<i32: 1>} : vector<16x16xi32>
    %c3_i32_5 = arith.constant 3 : i32
    %15 = vector.broadcast %c3_i32_5 : i32 to vector<16x16xi32>
    %16 = arith.shrsi %14, %15 : vector<16x16xi32>
    %c0_6 = arith.constant 0 : index
    %c0_7 = arith.constant 0 : index
    %17 = vector.load %arg1[%c0_6, %c0_7] : memref<1x16xi32, #tpu.memory_space<vmem>>, vector<1x16xi32>
    %c0_i32 = arith.constant 0 : i32
    %18 = vector.broadcast %c0_i32 : i32 to vector<1x16xi32>
    %19 = arith.cmpi sgt, %17, %18 : vector<1x16xi32>
    %20 = arith.cmpi eq, %13, %16 : vector<16x16xi32>
    %21 = vector.broadcast %19 : vector<1x16xi1> to vector<16x16xi1>
    %22 = arith.andi %20, %21 : vector<16x16xi1>
    %cst_8 = arith.constant 0.000000e+00 : f32
    %cst_9 = arith.constant -1.000000e+09 : f32
    %23 = vector.broadcast %cst_8 : f32 to vector<16x16xf32>
    %24 = vector.broadcast %cst_9 : f32 to vector<16x16xf32>
    %25 = arith.select %22, %23, %24 : vector<16x16xi1>, vector<16x16xf32>
    %26 = tpu.concatenate %25, %25 in 0 : vector<16x16xf32>, vector<16x16xf32> -> vector<32x16xf32>
    %c0_10 = arith.constant 0 : index
    %c0_11 = arith.constant 0 : index
    %c0_12 = arith.constant 0 : index
    %27 = vector.load %arg4[%c0_10, %c0_11, %c0_12] : memref<2x32x96xf32, #tpu.memory_space<vmem>>, vector<1x32x96xf32>
    %28 = vector.shape_cast %27 : vector<1x32x96xf32> to vector<32x96xf32>
    %c0_13 = arith.constant 0 : index
    %c0_14 = arith.constant 0 : index
    %c0_15 = arith.constant 0 : index
    %29 = vector.load %arg5[%c0_13, %c0_14, %c0_15] : memref<2x32x32xf32, #tpu.memory_space<vmem>>, vector<1x32x32xf32>
    %30 = vector.shape_cast %29 : vector<1x32x32xf32> to vector<32x32xf32>
    %c0_16 = arith.constant 0 : index
    %c0_17 = arith.constant 0 : index
    %c0_18 = arith.constant 0 : index
    %31 = vector.load %arg6[%c0_16, %c0_17, %c0_18] : memref<2x32x128xf32, #tpu.memory_space<vmem>>, vector<1x32x128xf32>
    %32 = vector.shape_cast %31 : vector<1x32x128xf32> to vector<32x128xf32>
    %c0_19 = arith.constant 0 : index
    %c0_20 = arith.constant 0 : index
    %c0_21 = arith.constant 0 : index
    %33 = vector.load %arg7[%c0_19, %c0_20, %c0_21] : memref<2x128x32xf32, #tpu.memory_space<vmem>>, vector<1x128x32xf32>
    %34 = vector.shape_cast %33 : vector<1x128x32xf32> to vector<128x32xf32>
    %c0_22 = arith.constant 0 : index
    %c0_23 = arith.constant 0 : index
    %c0_24 = arith.constant 0 : index
    %35 = vector.load %arg8[%c0_22, %c0_23, %c0_24] : memref<2x8x128xf32, #tpu.memory_space<vmem>>, vector<1x8x128xf32>
    %36 = vector.shape_cast %35 : vector<1x8x128xf32> to vector<8x128xf32>
    %37 = vector.extract_strided_slice %36 {offsets = [0, 0], sizes = [1, 96], strides = [1, 1]} : vector<8x128xf32> to vector<1x96xf32>
    %38 = vector.extract_strided_slice %36 {offsets = [1, 0], sizes = [1, 32], strides = [1, 1]} : vector<8x128xf32> to vector<1x32xf32>
    %39 = vector.extract_strided_slice %36 {offsets = [2, 0], sizes = [1, 32], strides = [1, 1]} : vector<8x128xf32> to vector<1x32xf32>
    %40 = vector.extract_strided_slice %36 {offsets = [3, 0], sizes = [1, 32], strides = [1, 1]} : vector<8x128xf32> to vector<1x32xf32>
    %41 = vector.extract_strided_slice %36 {offsets = [4, 0], sizes = [1, 128], strides = [1, 1]} : vector<8x128xf32> to vector<1x128xf32>
    %42 = vector.extract_strided_slice %36 {offsets = [5, 0], sizes = [1, 32], strides = [1, 1]} : vector<8x128xf32> to vector<1x32xf32>
    %43 = vector.extract_strided_slice %36 {offsets = [6, 0], sizes = [1, 32], strides = [1, 1]} : vector<8x128xf32> to vector<1x32xf32>
    %44 = vector.extract_strided_slice %36 {offsets = [7, 0], sizes = [1, 32], strides = [1, 1]} : vector<8x128xf32> to vector<1x32xf32>
    %cst_25 = arith.constant dense<0.000000e+00> : vector<16x96xf32>
    %45 = tpu.matmul %10, %28, %cst_25 {dimension_numbers = #tpu.dot_dimension_numbers<[1], [0], [0], [1], [0, 0, 1, 1], [], []>} : vector<16x32xf32>, vector<32x96xf32>, vector<16x96xf32> -> vector<16x96xf32>
    %46 = vector.broadcast %37 : vector<1x96xf32> to vector<16x96xf32>
    %47 = arith.addf %45, %46 : vector<16x96xf32>
    %48 = vector.extract_strided_slice %47 {offsets = [0, 0], sizes = [16, 16], strides = [1, 1]} : vector<16x96xf32> to vector<16x16xf32>
    %49 = vector.extract_strided_slice %47 {offsets = [0, 32], sizes = [16, 16], strides = [1, 1]} : vector<16x96xf32> to vector<16x16xf32>
    %cst_26 = arith.constant dense<0.000000e+00> : vector<16x16xf32>
    %50 = tpu.matmul %48, %49, %cst_26 {dimension_numbers = #tpu.dot_dimension_numbers<[1], [1], [0], [0], [0, 0, 1, 0], [], []>} : vector<16x16xf32>, vector<16x16xf32>, vector<16x16xf32> -> vector<16x16xf32>
    %51 = vector.extract_strided_slice %47 {offsets = [0, 16], sizes = [16, 16], strides = [1, 1]} : vector<16x96xf32> to vector<16x16xf32>
    %52 = vector.extract_strided_slice %47 {offsets = [0, 48], sizes = [16, 16], strides = [1, 1]} : vector<16x96xf32> to vector<16x16xf32>
    %cst_27 = arith.constant dense<0.000000e+00> : vector<16x16xf32>
    %53 = tpu.matmul %51, %52, %cst_27 {dimension_numbers = #tpu.dot_dimension_numbers<[1], [1], [0], [0], [0, 0, 1, 0], [], []>} : vector<16x16xf32>, vector<16x16xf32>, vector<16x16xf32> -> vector<16x16xf32>
    %54 = tpu.concatenate %50, %53 in 0 : vector<16x16xf32>, vector<16x16xf32> -> vector<32x16xf32>
    %55 = arith.addf %54, %26 : vector<32x16xf32>
    %cst_28 = arith.constant dense<0xFF800000> : vector<32xf32>
    %56 = vector.multi_reduction <maximumf>, %55, %cst_28 [1] : vector<32x16xf32> to vector<32xf32>
    %57 = vector.shape_cast %56 : vector<32xf32> to vector<32x1xf32>
    %58 = vector.broadcast %57 : vector<32x1xf32> to vector<32x16xf32>
    %59 = arith.subf %55, %58 : vector<32x16xf32>
    %60 = math.exp %59 : vector<32x16xf32>
    %cst_29 = arith.constant dense<0.000000e+00> : vector<32xf32>
    %61 = vector.multi_reduction <add>, %60, %cst_29 [1] : vector<32x16xf32> to vector<32xf32>
    %62 = vector.shape_cast %61 : vector<32xf32> to vector<32x1xf32>
    %63 = tpu.reciprocal %62 {approx = true} : vector<32x1xf32> -> vector<32x1xf32>
    %64 = vector.broadcast %63 : vector<32x1xf32> to vector<32x16xf32>
    %65 = arith.mulf %60, %64 : vector<32x16xf32>
    %66 = vector.extract_strided_slice %47 {offsets = [0, 64], sizes = [16, 16], strides = [1, 1]} : vector<16x96xf32> to vector<16x16xf32>
    %67 = vector.extract_strided_slice %65 {offsets = [0, 0], sizes = [16, 16], strides = [1, 1]} : vector<32x16xf32> to vector<16x16xf32>
    %cst_30 = arith.constant dense<0.000000e+00> : vector<16x16xf32>
    %68 = tpu.matmul %67, %66, %cst_30 {dimension_numbers = #tpu.dot_dimension_numbers<[1], [0], [0], [1], [0, 0, 1, 1], [], []>} : vector<16x16xf32>, vector<16x16xf32>, vector<16x16xf32> -> vector<16x16xf32>
    %69 = vector.extract_strided_slice %47 {offsets = [0, 80], sizes = [16, 16], strides = [1, 1]} : vector<16x96xf32> to vector<16x16xf32>
    %70 = vector.extract_strided_slice %65 {offsets = [16, 0], sizes = [16, 16], strides = [1, 1]} : vector<32x16xf32> to vector<16x16xf32>
    %cst_31 = arith.constant dense<0.000000e+00> : vector<16x16xf32>
    %71 = tpu.matmul %70, %69, %cst_31 {dimension_numbers = #tpu.dot_dimension_numbers<[1], [0], [0], [1], [0, 0, 1, 1], [], []>} : vector<16x16xf32>, vector<16x16xf32>, vector<16x16xf32> -> vector<16x16xf32>
    %72 = tpu.concatenate %68, %71 in 1 : vector<16x16xf32>, vector<16x16xf32> -> vector<16x32xf32>
    %cst_32 = arith.constant dense<0.000000e+00> : vector<16x32xf32>
    %73 = tpu.matmul %72, %30, %cst_32 {dimension_numbers = #tpu.dot_dimension_numbers<[1], [0], [0], [1], [0, 0, 1, 1], [], []>} : vector<16x32xf32>, vector<32x32xf32>, vector<16x32xf32> -> vector<16x32xf32>
    %74 = vector.broadcast %38 : vector<1x32xf32> to vector<16x32xf32>
    %75 = arith.addf %73, %74 : vector<16x32xf32>
    %76 = arith.addf %10, %75 : vector<16x32xf32>
    %cst_33 = arith.constant dense<0.000000e+00> : vector<16xf32>
    %77 = vector.multi_reduction <add>, %76, %cst_33 [1] : vector<16x32xf32> to vector<16xf32>
    %78 = vector.shape_cast %77 : vector<16xf32> to vector<16x1xf32>
    %cst_34 = arith.constant 3.200000e+01 : f32
    %79 = vector.broadcast %cst_34 : f32 to vector<16x1xf32>
    %80 = arith.divf %78, %79 : vector<16x1xf32>
    %81 = vector.broadcast %80 : vector<16x1xf32> to vector<16x32xf32>
    %82 = arith.subf %76, %81 : vector<16x32xf32>
    %83 = arith.mulf %82, %82 : vector<16x32xf32>
    %cst_35 = arith.constant dense<0.000000e+00> : vector<16xf32>
    %84 = vector.multi_reduction <add>, %83, %cst_35 [1] : vector<16x32xf32> to vector<16xf32>
    %85 = vector.shape_cast %84 : vector<16xf32> to vector<16x1xf32>
    %cst_36 = arith.constant 3.200000e+01 : f32
    %86 = vector.broadcast %cst_36 : f32 to vector<16x1xf32>
    %87 = arith.divf %85, %86 : vector<16x1xf32>
    %88 = vector.broadcast %80 : vector<16x1xf32> to vector<16x32xf32>
    %89 = arith.subf %76, %88 : vector<16x32xf32>
    %cst_37 = arith.constant 9.99999974E-6 : f32
    %90 = vector.broadcast %cst_37 : f32 to vector<16x1xf32>
    %91 = arith.addf %87, %90 : vector<16x1xf32>
    %92 = math.rsqrt %91 : vector<16x1xf32>
    %93 = vector.broadcast %92 : vector<16x1xf32> to vector<16x32xf32>
    %94 = arith.mulf %89, %93 : vector<16x32xf32>
    %95 = vector.broadcast %39 : vector<1x32xf32> to vector<16x32xf32>
    %96 = arith.mulf %94, %95 : vector<16x32xf32>
    %97 = vector.broadcast %40 : vector<1x32xf32> to vector<16x32xf32>
    %98 = arith.addf %96, %97 : vector<16x32xf32>
    %cst_38 = arith.constant dense<0.000000e+00> : vector<16x128xf32>
    %99 = tpu.matmul %98, %32, %cst_38 {dimension_numbers = #tpu.dot_dimension_numbers<[1], [0], [0], [1], [0, 0, 1, 1], [], []>} : vector<16x32xf32>, vector<32x128xf32>, vector<16x128xf32> -> vector<16x128xf32>
    %100 = vector.broadcast %41 : vector<1x128xf32> to vector<16x128xf32>
    %101 = arith.addf %99, %100 : vector<16x128xf32>
    %102 = arith.mulf %101, %101 : vector<16x128xf32>
    %103 = arith.mulf %101, %102 : vector<16x128xf32>
    %cst_39 = arith.constant 4.471500e-02 : f32
    %104 = vector.broadcast %cst_39 : f32 to vector<16x128xf32>
    %105 = arith.mulf %104, %103 : vector<16x128xf32>
    %106 = arith.addf %101, %105 : vector<16x128xf32>
    %cst_40 = arith.constant 0.797884583 : f32
    %107 = vector.broadcast %cst_40 : f32 to vector<16x128xf32>
    %108 = arith.mulf %107, %106 : vector<16x128xf32>
    %109 = math.tanh %108 : vector<16x128xf32>
    %cst_41 = arith.constant 1.000000e+00 : f32
    %110 = vector.broadcast %cst_41 : f32 to vector<16x128xf32>
    %111 = arith.addf %110, %109 : vector<16x128xf32>
    %cst_42 = arith.constant 5.000000e-01 : f32
    %112 = vector.broadcast %cst_42 : f32 to vector<16x128xf32>
    %113 = arith.mulf %112, %111 : vector<16x128xf32>
    %114 = arith.mulf %101, %113 : vector<16x128xf32>
    %cst_43 = arith.constant dense<0.000000e+00> : vector<16x32xf32>
    %115 = tpu.matmul %114, %34, %cst_43 {dimension_numbers = #tpu.dot_dimension_numbers<[1], [0], [0], [1], [0, 0, 1, 1], [], []>} : vector<16x128xf32>, vector<128x32xf32>, vector<16x32xf32> -> vector<16x32xf32>
    %116 = vector.broadcast %42 : vector<1x32xf32> to vector<16x32xf32>
    %117 = arith.addf %115, %116 : vector<16x32xf32>
    %118 = arith.addf %98, %117 : vector<16x32xf32>
    %cst_44 = arith.constant dense<0.000000e+00> : vector<16xf32>
    %119 = vector.multi_reduction <add>, %118, %cst_44 [1] : vector<16x32xf32> to vector<16xf32>
    %120 = vector.shape_cast %119 : vector<16xf32> to vector<16x1xf32>
    %cst_45 = arith.constant 3.200000e+01 : f32
    %121 = vector.broadcast %cst_45 : f32 to vector<16x1xf32>
    %122 = arith.divf %120, %121 : vector<16x1xf32>
    %123 = vector.broadcast %122 : vector<16x1xf32> to vector<16x32xf32>
    %124 = arith.subf %118, %123 : vector<16x32xf32>
    %125 = arith.mulf %124, %124 : vector<16x32xf32>
    %cst_46 = arith.constant dense<0.000000e+00> : vector<16xf32>
    %126 = vector.multi_reduction <add>, %125, %cst_46 [1] : vector<16x32xf32> to vector<16xf32>
    %127 = vector.shape_cast %126 : vector<16xf32> to vector<16x1xf32>
    %cst_47 = arith.constant 3.200000e+01 : f32
    %128 = vector.broadcast %cst_47 : f32 to vector<16x1xf32>
    %129 = arith.divf %127, %128 : vector<16x1xf32>
    %130 = vector.broadcast %122 : vector<16x1xf32> to vector<16x32xf32>
    %131 = arith.subf %118, %130 : vector<16x32xf32>
    %cst_48 = arith.constant 9.99999974E-6 : f32
    %132 = vector.broadcast %cst_48 : f32 to vector<16x1xf32>
    %133 = arith.addf %129, %132 : vector<16x1xf32>
    %134 = math.rsqrt %133 : vector<16x1xf32>
    %135 = vector.broadcast %134 : vector<16x1xf32> to vector<16x32xf32>
    %136 = arith.mulf %131, %135 : vector<16x32xf32>
    %137 = vector.broadcast %43 : vector<1x32xf32> to vector<16x32xf32>
    %138 = arith.mulf %136, %137 : vector<16x32xf32>
    %139 = vector.broadcast %44 : vector<1x32xf32> to vector<16x32xf32>
    %140 = arith.addf %138, %139 : vector<16x32xf32>
    %c1 = arith.constant 1 : index
    %c0_49 = arith.constant 0 : index
    %c0_50 = arith.constant 0 : index
    %141 = vector.load %arg4[%c1, %c0_49, %c0_50] : memref<2x32x96xf32, #tpu.memory_space<vmem>>, vector<1x32x96xf32>
    %142 = vector.shape_cast %141 : vector<1x32x96xf32> to vector<32x96xf32>
    %c1_51 = arith.constant 1 : index
    %c0_52 = arith.constant 0 : index
    %c0_53 = arith.constant 0 : index
    %143 = vector.load %arg5[%c1_51, %c0_52, %c0_53] : memref<2x32x32xf32, #tpu.memory_space<vmem>>, vector<1x32x32xf32>
    %144 = vector.shape_cast %143 : vector<1x32x32xf32> to vector<32x32xf32>
    %c1_54 = arith.constant 1 : index
    %c0_55 = arith.constant 0 : index
    %c0_56 = arith.constant 0 : index
    %145 = vector.load %arg6[%c1_54, %c0_55, %c0_56] : memref<2x32x128xf32, #tpu.memory_space<vmem>>, vector<1x32x128xf32>
    %146 = vector.shape_cast %145 : vector<1x32x128xf32> to vector<32x128xf32>
    %c1_57 = arith.constant 1 : index
    %c0_58 = arith.constant 0 : index
    %c0_59 = arith.constant 0 : index
    %147 = vector.load %arg7[%c1_57, %c0_58, %c0_59] : memref<2x128x32xf32, #tpu.memory_space<vmem>>, vector<1x128x32xf32>
    %148 = vector.shape_cast %147 : vector<1x128x32xf32> to vector<128x32xf32>
    %c1_60 = arith.constant 1 : index
    %c0_61 = arith.constant 0 : index
    %c0_62 = arith.constant 0 : index
    %149 = vector.load %arg8[%c1_60, %c0_61, %c0_62] : memref<2x8x128xf32, #tpu.memory_space<vmem>>, vector<1x8x128xf32>
    %150 = vector.shape_cast %149 : vector<1x8x128xf32> to vector<8x128xf32>
    %151 = vector.extract_strided_slice %150 {offsets = [0, 0], sizes = [1, 96], strides = [1, 1]} : vector<8x128xf32> to vector<1x96xf32>
    %152 = vector.extract_strided_slice %150 {offsets = [1, 0], sizes = [1, 32], strides = [1, 1]} : vector<8x128xf32> to vector<1x32xf32>
    %153 = vector.extract_strided_slice %150 {offsets = [2, 0], sizes = [1, 32], strides = [1, 1]} : vector<8x128xf32> to vector<1x32xf32>
    %154 = vector.extract_strided_slice %150 {offsets = [3, 0], sizes = [1, 32], strides = [1, 1]} : vector<8x128xf32> to vector<1x32xf32>
    %155 = vector.extract_strided_slice %150 {offsets = [4, 0], sizes = [1, 128], strides = [1, 1]} : vector<8x128xf32> to vector<1x128xf32>
    %156 = vector.extract_strided_slice %150 {offsets = [5, 0], sizes = [1, 32], strides = [1, 1]} : vector<8x128xf32> to vector<1x32xf32>
    %157 = vector.extract_strided_slice %150 {offsets = [6, 0], sizes = [1, 32], strides = [1, 1]} : vector<8x128xf32> to vector<1x32xf32>
    %158 = vector.extract_strided_slice %150 {offsets = [7, 0], sizes = [1, 32], strides = [1, 1]} : vector<8x128xf32> to vector<1x32xf32>
    %cst_63 = arith.constant dense<0.000000e+00> : vector<16x96xf32>
    %159 = tpu.matmul %140, %142, %cst_63 {dimension_numbers = #tpu.dot_dimension_numbers<[1], [0], [0], [1], [0, 0, 1, 1], [], []>} : vector<16x32xf32>, vector<32x96xf32>, vector<16x96xf32> -> vector<16x96xf32>
    %160 = vector.broadcast %151 : vector<1x96xf32> to vector<16x96xf32>
    %161 = arith.addf %159, %160 : vector<16x96xf32>
    %162 = vector.extract_strided_slice %161 {offsets = [0, 0], sizes = [16, 16], strides = [1, 1]} : vector<16x96xf32> to vector<16x16xf32>
    %163 = vector.extract_strided_slice %161 {offsets = [0, 32], sizes = [16, 16], strides = [1, 1]} : vector<16x96xf32> to vector<16x16xf32>
    %cst_64 = arith.constant dense<0.000000e+00> : vector<16x16xf32>
    %164 = tpu.matmul %162, %163, %cst_64 {dimension_numbers = #tpu.dot_dimension_numbers<[1], [1], [0], [0], [0, 0, 1, 0], [], []>} : vector<16x16xf32>, vector<16x16xf32>, vector<16x16xf32> -> vector<16x16xf32>
    %165 = vector.extract_strided_slice %161 {offsets = [0, 16], sizes = [16, 16], strides = [1, 1]} : vector<16x96xf32> to vector<16x16xf32>
    %166 = vector.extract_strided_slice %161 {offsets = [0, 48], sizes = [16, 16], strides = [1, 1]} : vector<16x96xf32> to vector<16x16xf32>
    %cst_65 = arith.constant dense<0.000000e+00> : vector<16x16xf32>
    %167 = tpu.matmul %165, %166, %cst_65 {dimension_numbers = #tpu.dot_dimension_numbers<[1], [1], [0], [0], [0, 0, 1, 0], [], []>} : vector<16x16xf32>, vector<16x16xf32>, vector<16x16xf32> -> vector<16x16xf32>
    %168 = tpu.concatenate %164, %167 in 0 : vector<16x16xf32>, vector<16x16xf32> -> vector<32x16xf32>
    %169 = arith.addf %168, %26 : vector<32x16xf32>
    %cst_66 = arith.constant dense<0xFF800000> : vector<32xf32>
    %170 = vector.multi_reduction <maximumf>, %169, %cst_66 [1] : vector<32x16xf32> to vector<32xf32>
    %171 = vector.shape_cast %170 : vector<32xf32> to vector<32x1xf32>
    %172 = vector.broadcast %171 : vector<32x1xf32> to vector<32x16xf32>
    %173 = arith.subf %169, %172 : vector<32x16xf32>
    %174 = math.exp %173 : vector<32x16xf32>
    %cst_67 = arith.constant dense<0.000000e+00> : vector<32xf32>
    %175 = vector.multi_reduction <add>, %174, %cst_67 [1] : vector<32x16xf32> to vector<32xf32>
    %176 = vector.shape_cast %175 : vector<32xf32> to vector<32x1xf32>
    %177 = tpu.reciprocal %176 {approx = true} : vector<32x1xf32> -> vector<32x1xf32>
    %178 = vector.broadcast %177 : vector<32x1xf32> to vector<32x16xf32>
    %179 = arith.mulf %174, %178 : vector<32x16xf32>
    %180 = vector.extract_strided_slice %161 {offsets = [0, 64], sizes = [16, 16], strides = [1, 1]} : vector<16x96xf32> to vector<16x16xf32>
    %181 = vector.extract_strided_slice %179 {offsets = [0, 0], sizes = [16, 16], strides = [1, 1]} : vector<32x16xf32> to vector<16x16xf32>
    %cst_68 = arith.constant dense<0.000000e+00> : vector<16x16xf32>
    %182 = tpu.matmul %181, %180, %cst_68 {dimension_numbers = #tpu.dot_dimension_numbers<[1], [0], [0], [1], [0, 0, 1, 1], [], []>} : vector<16x16xf32>, vector<16x16xf32>, vector<16x16xf32> -> vector<16x16xf32>
    %183 = vector.extract_strided_slice %161 {offsets = [0, 80], sizes = [16, 16], strides = [1, 1]} : vector<16x96xf32> to vector<16x16xf32>
    %184 = vector.extract_strided_slice %179 {offsets = [16, 0], sizes = [16, 16], strides = [1, 1]} : vector<32x16xf32> to vector<16x16xf32>
    %cst_69 = arith.constant dense<0.000000e+00> : vector<16x16xf32>
    %185 = tpu.matmul %184, %183, %cst_69 {dimension_numbers = #tpu.dot_dimension_numbers<[1], [0], [0], [1], [0, 0, 1, 1], [], []>} : vector<16x16xf32>, vector<16x16xf32>, vector<16x16xf32> -> vector<16x16xf32>
    %186 = tpu.concatenate %182, %185 in 1 : vector<16x16xf32>, vector<16x16xf32> -> vector<16x32xf32>
    %cst_70 = arith.constant dense<0.000000e+00> : vector<16x32xf32>
    %187 = tpu.matmul %186, %144, %cst_70 {dimension_numbers = #tpu.dot_dimension_numbers<[1], [0], [0], [1], [0, 0, 1, 1], [], []>} : vector<16x32xf32>, vector<32x32xf32>, vector<16x32xf32> -> vector<16x32xf32>
    %188 = vector.broadcast %152 : vector<1x32xf32> to vector<16x32xf32>
    %189 = arith.addf %187, %188 : vector<16x32xf32>
    %190 = arith.addf %140, %189 : vector<16x32xf32>
    %cst_71 = arith.constant dense<0.000000e+00> : vector<16xf32>
    %191 = vector.multi_reduction <add>, %190, %cst_71 [1] : vector<16x32xf32> to vector<16xf32>
    %192 = vector.shape_cast %191 : vector<16xf32> to vector<16x1xf32>
    %cst_72 = arith.constant 3.200000e+01 : f32
    %193 = vector.broadcast %cst_72 : f32 to vector<16x1xf32>
    %194 = arith.divf %192, %193 : vector<16x1xf32>
    %195 = vector.broadcast %194 : vector<16x1xf32> to vector<16x32xf32>
    %196 = arith.subf %190, %195 : vector<16x32xf32>
    %197 = arith.mulf %196, %196 : vector<16x32xf32>
    %cst_73 = arith.constant dense<0.000000e+00> : vector<16xf32>
    %198 = vector.multi_reduction <add>, %197, %cst_73 [1] : vector<16x32xf32> to vector<16xf32>
    %199 = vector.shape_cast %198 : vector<16xf32> to vector<16x1xf32>
    %cst_74 = arith.constant 3.200000e+01 : f32
    %200 = vector.broadcast %cst_74 : f32 to vector<16x1xf32>
    %201 = arith.divf %199, %200 : vector<16x1xf32>
    %202 = vector.broadcast %194 : vector<16x1xf32> to vector<16x32xf32>
    %203 = arith.subf %190, %202 : vector<16x32xf32>
    %cst_75 = arith.constant 9.99999974E-6 : f32
    %204 = vector.broadcast %cst_75 : f32 to vector<16x1xf32>
    %205 = arith.addf %201, %204 : vector<16x1xf32>
    %206 = math.rsqrt %205 : vector<16x1xf32>
    %207 = vector.broadcast %206 : vector<16x1xf32> to vector<16x32xf32>
    %208 = arith.mulf %203, %207 : vector<16x32xf32>
    %209 = vector.broadcast %153 : vector<1x32xf32> to vector<16x32xf32>
    %210 = arith.mulf %208, %209 : vector<16x32xf32>
    %211 = vector.broadcast %154 : vector<1x32xf32> to vector<16x32xf32>
    %212 = arith.addf %210, %211 : vector<16x32xf32>
    %cst_76 = arith.constant dense<0.000000e+00> : vector<16x128xf32>
    %213 = tpu.matmul %212, %146, %cst_76 {dimension_numbers = #tpu.dot_dimension_numbers<[1], [0], [0], [1], [0, 0, 1, 1], [], []>} : vector<16x32xf32>, vector<32x128xf32>, vector<16x128xf32> -> vector<16x128xf32>
    %214 = vector.broadcast %155 : vector<1x128xf32> to vector<16x128xf32>
    %215 = arith.addf %213, %214 : vector<16x128xf32>
    %216 = arith.mulf %215, %215 : vector<16x128xf32>
    %217 = arith.mulf %215, %216 : vector<16x128xf32>
    %cst_77 = arith.constant 4.471500e-02 : f32
    %218 = vector.broadcast %cst_77 : f32 to vector<16x128xf32>
    %219 = arith.mulf %218, %217 : vector<16x128xf32>
    %220 = arith.addf %215, %219 : vector<16x128xf32>
    %cst_78 = arith.constant 0.797884583 : f32
    %221 = vector.broadcast %cst_78 : f32 to vector<16x128xf32>
    %222 = arith.mulf %221, %220 : vector<16x128xf32>
    %223 = math.tanh %222 : vector<16x128xf32>
    %cst_79 = arith.constant 1.000000e+00 : f32
    %224 = vector.broadcast %cst_79 : f32 to vector<16x128xf32>
    %225 = arith.addf %224, %223 : vector<16x128xf32>
    %cst_80 = arith.constant 5.000000e-01 : f32
    %226 = vector.broadcast %cst_80 : f32 to vector<16x128xf32>
    %227 = arith.mulf %226, %225 : vector<16x128xf32>
    %228 = arith.mulf %215, %227 : vector<16x128xf32>
    %cst_81 = arith.constant dense<0.000000e+00> : vector<16x32xf32>
    %229 = tpu.matmul %228, %148, %cst_81 {dimension_numbers = #tpu.dot_dimension_numbers<[1], [0], [0], [1], [0, 0, 1, 1], [], []>} : vector<16x128xf32>, vector<128x32xf32>, vector<16x32xf32> -> vector<16x32xf32>
    %230 = vector.broadcast %156 : vector<1x32xf32> to vector<16x32xf32>
    %231 = arith.addf %229, %230 : vector<16x32xf32>
    %232 = arith.addf %212, %231 : vector<16x32xf32>
    %cst_82 = arith.constant dense<0.000000e+00> : vector<16xf32>
    %233 = vector.multi_reduction <add>, %232, %cst_82 [1] : vector<16x32xf32> to vector<16xf32>
    %234 = vector.shape_cast %233 : vector<16xf32> to vector<16x1xf32>
    %cst_83 = arith.constant 3.200000e+01 : f32
    %235 = vector.broadcast %cst_83 : f32 to vector<16x1xf32>
    %236 = arith.divf %234, %235 : vector<16x1xf32>
    %237 = vector.broadcast %236 : vector<16x1xf32> to vector<16x32xf32>
    %238 = arith.subf %232, %237 : vector<16x32xf32>
    %239 = arith.mulf %238, %238 : vector<16x32xf32>
    %cst_84 = arith.constant dense<0.000000e+00> : vector<16xf32>
    %240 = vector.multi_reduction <add>, %239, %cst_84 [1] : vector<16x32xf32> to vector<16xf32>
    %241 = vector.shape_cast %240 : vector<16xf32> to vector<16x1xf32>
    %cst_85 = arith.constant 3.200000e+01 : f32
    %242 = vector.broadcast %cst_85 : f32 to vector<16x1xf32>
    %243 = arith.divf %241, %242 : vector<16x1xf32>
    %244 = vector.broadcast %236 : vector<16x1xf32> to vector<16x32xf32>
    %245 = arith.subf %232, %244 : vector<16x32xf32>
    %cst_86 = arith.constant 9.99999974E-6 : f32
    %246 = vector.broadcast %cst_86 : f32 to vector<16x1xf32>
    %247 = arith.addf %243, %246 : vector<16x1xf32>
    %248 = math.rsqrt %247 : vector<16x1xf32>
    %249 = vector.broadcast %248 : vector<16x1xf32> to vector<16x32xf32>
    %250 = arith.mulf %245, %249 : vector<16x32xf32>
    %251 = vector.broadcast %157 : vector<1x32xf32> to vector<16x32xf32>
    %252 = arith.mulf %250, %251 : vector<16x32xf32>
    %253 = vector.broadcast %158 : vector<1x32xf32> to vector<16x32xf32>
    %254 = arith.addf %252, %253 : vector<16x32xf32>
    %cst_87 = arith.constant dense<0.000000e+00> : vector<16x128xf32>
    %255 = tpu.matmul %254, %0, %cst_87 {dimension_numbers = #tpu.dot_dimension_numbers<[1], [1], [0], [0], [0, 0, 1, 0], [], []>} : vector<16x32xf32>, vector<128x32xf32>, vector<16x128xf32> -> vector<16x128xf32>
    %c0_88 = arith.constant 0 : index
    %c0_89 = arith.constant 0 : index
    %256 = vector.load %arg9[%c0_88, %c0_89] : memref<16x128xf32, #tpu.memory_space<vmem>>, vector<16x128xf32>
    tpu.vector_store %arg9[%c0_88, %c0_89], %255 {strides = array<i32>} : memref<16x128xf32, #tpu.memory_space<vmem>>, vector<16x128xf32>,
    return
  }
}

</mosaic_0001>

<bundles_post_ra>
// kernel: sasrec_forward.1
= control target key start
LH: loop header
LB: loop body
LE: loop exit
PB: predicated region body
PF: predicated region fallthrough
CT: control target
= control target key end

     0   :  { %v2876_v0 = vmov 0   ;;  %v50_v30 = vlaneseq  ;;  %v2877_v33 = vmov 1.0   ;;  %vm193_vm2 = vcmask 261120   ;;  %s2878_s11 = smov 112   ;;  %s2879_s12 = smov 96   ;;  %s3493_s0 = inlined_call_operand.vmem [shape: s32[16,1], index: 0, kind: input, shape index: {}]   ;;  %s3494_s2 = inlined_call_operand.vmem [shape: f32[128,32], index: 2, kind: input, shape index: {}]   ;;  %s3495_s4 = inlined_call_operand.vmem [shape: f32[2,32,96], index: 4, kind: input, shape index: {}]   ;;  %s3496_s3 = inlined_call_operand.vmem [shape: f32[8,32], index: 3, kind: input, shape index: {}]   ;;  %s3497_s8 = inlined_call_operand.vmem [shape: f32[2,8,128], index: 8, kind: input, shape index: {}]   ;;  %s3498_s1 = inlined_call_operand.vmem [shape: s32[1,16], index: 1, kind: input, shape index: {}]   ;;  %s3499_s5 = inlined_call_operand.vmem [shape: f32[2,32,32], index: 5, kind: input, shape index: {}]   ;;  %s3500_s6 = inlined_call_operand.vmem [shape: f32[2,32,128], index: 6, kind: input, shape index: {}]   ;;  %s3501_s7 = inlined_call_operand.vmem [shape: f32[2,128,32], index: 7, kind: input, shape index: {}]   ;;  %s3502_s9 = inlined_call_operand.vmem [shape: f32[16,128], index: 9, kind: output, shape index: {}]  }
   0x1   :  { %2779 = vset.pattern.permute.xlu0 %v2876_v0  ;;  %v48_v1 = vld [vmem:[%s3493_s0] sm:$0xff]  ;;  %v33_v3 = vld [vmem:[%s3494_s2 + $0x8] sm:$0xff]  ;;  %v34_v4 = vld [vmem:[%s3494_s2 + $0x10] sm:$0xff]  ;;  %vm281_vm3 = vcmask 130048   ;;  %s2880_s13 = smov 80   ;;  %s2883_s16 = smov 48  }
   0x2   :  { %53 = vperm.xlu0 %2779, %v48_v1   ;;  %v32_v2 = vld [vmem:[%s3494_s2] sm:$0xff]  ;;  %v49_v5 = vld [vmem:[%s3493_s0 + $0x8] sm:$0xff]  ;;  %v35_v7 = vld [vmem:[%s3494_s2 + $0x18] sm:$0xff]  ;;  %v3028_v31 = vand.u32 127, %v50_v30  ;;  %v3049_v43 = vshrl.u32 %v50_v30, 7  ;;  %s2884_s0 = smov 16  }
   0x3   :  { %v2951_v6 = vpack.c.bf16 %v33_v3, %v32_v2  ;;  %v36_v8 = vld [vmem:[%s3494_s2 + $0x20] sm:$0xff]  ;;  %v37_v9 = vld [vmem:[%s3494_s2 + $0x28] sm:$0xff]  ;;  %v2963_v10 = vpack.c.bf16 %v35_v7, %v34_v4  ;;  %v38_v12 = vld [vmem:[%s3494_s2 + $0x30] sm:$0xff] }
   0x4   :  { %v2967_v11 = vpack.c.bf16 %v37_v9, %v36_v8  ;;  %v39_v13 = vld [vmem:[%s3494_s2 + $0x38] sm:$0xff]  ;;  %v40_v15 = vld [vmem:[%s3494_s2 + $0x40] sm:$0xff]  ;;  %v41_v16 = vld [vmem:[%s3494_s2 + $0x48] sm:$0xff]  ;;  %v3052_v44 = vsub.s32 0, %v3049_v43  ;;  %v142_v1 = vadd.s32 8, %v3049_v43  ;;  %v145_v4 = vshra.s32 %v3028_v31, 3 }
   0x5   :  { %2539 = vmatprep.subr.bf16.mxu0 %v2951_v6  ;;  %v2977_v14 = vpack.c.bf16 %v39_v13, %v38_v12  ;;  %v2987_v17 = vpack.c.bf16 %v41_v16, %v40_v15  ;;  %v42_v18 = vld [vmem:[%s3494_s2 + $0x50] sm:$0xff]  ;;  %v43_v19 = vld [vmem:[%s3494_s2 + $0x58] sm:$0xff]  ;;  %v44_v21 = vld [vmem:[%s3494_s2 + $0x60] sm:$0xff]  ;;  %v143_v7 = vshra.s32 %v3049_v43, 3  ;;  %v2881_v8 = vmov -1e+09  }
   0x6   :  { %56 = vperm.xlu0 %2779, %v49_v5   ;;  %2541 = vmatpush3.bf16.msra.mxu0 %v2951_v6  ;;  %v2997_v20 = vpack.c.bf16 %v43_v19, %v42_v18  ;;  %v45_v22 = vld [vmem:[%s3494_s2 + $0x68] sm:$0xff]  ;;  %v46_v24 = vld [vmem:[%s3494_s2 + $0x70] sm:$0xff]  ;;  %v47_v25 = vld [vmem:[%s3494_s2 + $0x78] sm:$0xff]  ;;  %v144_v3 = vshra.s32 %v142_v1, 3 }
   0x7   :  { %2543 = vmatprep.subr.bf16.mxu0 %v2963_v10  ;;  %v3007_v23 = vpack.c.bf16 %v45_v22, %v44_v21  ;;  %v3017_v26 = vpack.c.bf16 %v47_v25, %v46_v24  ;;  %v160_v27 = vld [vmem:[%s3495_s4] sm:$0xff]  ;;  %v161_v28 = vld [vmem:[%s3495_s4 + $0x8] sm:$0xff]  ;;  %v162_v35 = vld [vmem:[%s3495_s4 + $0x10] sm:$0xff]  ;;  %vm148_vm8 = vcmp.eq.s32.totalorder %v143_v7, %v145_v4 }
   0x8   :  { %v2570_v29 = vpack.c.bf16 %v161_v28, %v160_v27  ;;  %v163_v36 = vld [vmem:[%s3495_s4 + $0x18] sm:$0xff]  ;;  %v64_v38 = vld [vmem:[%s3496_s3] sm:$0xff]  ;;  %vm3073_vm4 = vmpackc.low %vm281_vm3, %vm281_vm3  ;;  %vm149_vm6 = vcmp.eq.s32.totalorder %v144_v3, %v145_v4 }
   0x9   :  { %v2574_v37 = vpack.c.bf16 %v163_v36, %v162_v35  ;;  %v3057_v45 = vld [vmem:[%s3497_s8] sm:$0xff]  ;;  %vm3425_vm11 = vmpackc.low %vm193_vm2, %vm193_vm2 }
   0xa   :  { %2545 = vmatpush3.bf16.msra.mxu0 %v2963_v10  ;;  %v192_v46 = vrot.slane %v3057_v45, %v3052_v44  ;;  %v146_v63 = vld [vmem:[%s3498_s1] sm:$0x1]  ;;  %s2882_s1 = smov 64  }
   0xb   :  { %2547 = vmatprep.subr.bf16.mxu0 %v2967_v11  ;;  %vm147_vm5 = vcmp.gt.s32.totalorder %v146_v63, 0 }
   0xc   :  { %v150_v2 = vsel %vm147_vm5, 1, %v2876_v0 }
   0xd   :  { %v154_v5 = vrot.slane %v150_v2, %v3052_v44 }
   0xe   :  { %2549 = vmatpush3.bf16.msra.mxu0 %v2967_v11 }
   0xf   :  { %2551 = vmatprep.subr.bf16.mxu0 %v2977_v14  ;;  %vm155_vm7 = vcmp.eq.s32.totalorder %v154_v5, 1 }
  0x10   :  { %vm157_vm9 = vmand %vm149_vm6, %vm155_vm7 }
  0x11   :  { %vm156_vm10 = vmand %vm148_vm8, %vm155_vm7  ;;  %v3095_v9 = vsel %vm157_vm9, 0.0, %v2881_v8 }
  0x12   :  { %2553 = vmatpush3.bf16.msra.mxu0 %v2977_v14  ;;  %v3097_v12 = vsel %vm156_vm10, 0.0, %v2881_v8 }
  0x13   :  { %2555 = vmatprep.subr.bf16.mxu0 %v2987_v17 }
  0x16   :  { %2557 = vmatpush3.bf16.msra.mxu0 %v2987_v17 }
  0x17   :  { %2559 = vmatprep.subr.bf16.mxu0 %v2997_v20 }
  0x1a   :  { %2561 = vmatpush3.bf16.msra.mxu0 %v2997_v20 }
  0x1b   :  { %2563 = vmatprep.subr.bf16.mxu0 %v3007_v23 }
  0x1e   :  { %2565 = vmatpush3.bf16.msra.mxu0 %v3007_v23 }
  0x1f   :  { %2567 = vmatprep.subr.bf16.mxu0 %v3017_v26 }
  0x22   :  { %2569 = vmatpush3.bf16.msra.mxu0 %v3017_v26 }
  0x23   :  { %2571 = vmatprep.subr.bf16.mxu0 %v2570_v29 }
  0x81   :  { %v54_v32 = vpop.permute.xlu0 %53 }
  0x82   :  { %vm58_vm0 = vcmp.eq.s32.totalorder %v54_v32, %v3028_v31 }
  0x83   :  { %2308 = vmatprep.mubr.msk.f32.mxu0 %vm58_vm0, %v2877_v33 }
  0x85   :  { %v57_v34 = vpop.permute.xlu0 %56 }
  0x86   :  { %vm59_vm1 = vcmp.eq.s32.totalorder %v57_v34, %v3028_v31 }
  0x87   :  { %2309 = vmatmul.mubr.msk.f32.vlgmr.msra.gmra.mrb[0].mxu0 %vm59_vm1, %v2877_v33 }
  0x88   :  { %2573 = vmatpush3.bf16.msra.mxu0 %v2570_v29 }
  0x89   :  { %2575 = vmatprep.subr.bf16.mxu0 %v2574_v37 }
  0x8c   :  { %2577 = vmatpush3.bf16.msra.mxu0 %v2574_v37 }
 0x15a   :  { %v2310_v39 = vpop.f32.mrb[0].mxu0 }
 0x15b   :  { %v131_v40 = vpop.f32.mrb[1].mxu0  ;;  %v3043_v42 = vadd.f32 %v2310_v39, %v64_v38 }
 0x15c   :  { %v3041_v41 = vadd.f32 %v131_v40, %v64_v38 }
 0x15e   :  { %2319 = vmatprep.mubr.msk.f32.mxu0 %vm193_vm2, %v3041_v41 }
 0x15f   :  { %2320 = vmatmul.mubr.msk.f32.vlgmr.msra.gmra.mrb[2].mxu0 %vm193_vm2, %v3043_v42 }
 0x232   :  { %v2321_v47 = vpop.f32.mrb[2].mxu0 }
 0x233   :  { %v272_v48 = vadd.f32 %v2321_v47, %v192_v46  ;;  %v266_v49 = vpop.f32.mrb[3].mxu0 }
 0x234   :  { %v267_v50 = vadd.f32 %v266_v49, %v192_v46 }
 0x236   :  { %365 = vrot.lane.b32.xlu0 %v267_v50, %s2878_s11  ;;  %2326 = vmatprep.mubr.msk.f32.mxu0 %vm281_vm3, %v267_v50  ;;  %v3063_v51 = vpack.i.bf16 %v272_v48, %v267_v50 }
 0x238   :  { %2781 = vrot.lane.b32.xlu1 %v3063_v51, %s2879_s12 }
 0x23c   :  { %2786 = vrot.lane.b32.xlu1 %v3063_v51, %s2880_s13 }
 0x240   :  { %367 = vrot.lane.b32.xlu1 %v272_v48, %s2878_s11 }
 0x2a8   :  { %v366_v52 = vpop.permute.xlu0 %365 }
 0x2a9   :  { %2333 = vmatprep.mubr.msk.f32.mxu1 %vm281_vm3, %v366_v52 }
 0x2aa   :  { %v2782_v53 = vpop.permute.xlu1 %2781 }
 0x2ab   :  { %v2784_v54 = vunpack.i.h.bf16 %v2782_v53  ;;  %v2783_v55 = vunpack.i.l.bf16 %v2782_v53 }
 0x2ad   :  { %v2578_v57 = vpack.c.bf16 %v2784_v54, %v2783_v55 }
 0x2ae   :  { %v2787_v58 = vpop.permute.xlu1 %2786 }
 0x2af   :  { %v2789_v59 = vunpack.i.h.bf16 %v2787_v58  ;;  %v2788_v60 = vunpack.i.l.bf16 %v2787_v58  ;;  %2580 = vmatprep.subr.msk.bf16.mxu0 %vm3073_vm4, %v2578_v57 }
 0x2b0   :  { %2583 = vmatpush3.bf16.xpose.msk.msra.mxu0 %vm3073_vm4, %v2578_v57 }
 0x2b1   :  { %v2584_v61 = vpack.c.bf16 %v2789_v59, %v2788_v60 }
 0x2b2   :  { %v368_v62 = vpop.permute.xlu1 %367 }
 0x2b3   :  { %2586 = vmatprep.subr.msk.bf16.mxu1 %vm3073_vm4, %v2584_v61 }
 0x2b4   :  { %2589 = vmatpush3.bf16.xpose.msk.msra.mxu1 %vm3073_vm4, %v2584_v61 }
 0x2b7   :  { %2327 = vmatmul.mubr.msk.f32.vlgmr.msra.gmra.mrb[4].mxu0 %vm281_vm3, %v272_v48 }
 0x2bb   :  { %2334 = vmatmul.mubr.msk.f32.vlgmr.msra.gmra.mrb[0].mxu1 %vm281_vm3, %v368_v62 }
 0x38a   :  { %v2328_v13 = vpop.f32.mrb[4].mxu0 }
 0x38b   :  { %v457_v0 = vadd.f32 %v2328_v13, %v3095_v9  ;;  %v356_v15 = vpop.f32.mrb[5].mxu0 }
 0x38c   :  { %v456_v16 = vadd.f32 %v356_v15, %v3097_v12 }
 0x38d   :  { %v463_v18 = vsel %vm281_vm3, %v457_v0, -inf }
 0x38e   :  { %v2335_v19 = vpop.f32.mrb[0].mxu1  ;;  %464 = vmax.xlane.f32.xlu1 %v463_v18  ;;  %v460_v21 = vsel %vm281_vm3, %v456_v16, -inf  ;;  %v164_v18 = vld [vmem:[%s3499_s5] sm:$0xff] }
 0x38f   :  { %v447_v22 = vpop.f32.mrb[1].mxu1  ;;  %461 = vmax.xlane.f32.xlu0 %v460_v21  ;;  %v459_v25 = vadd.f32 %v2335_v19, %v3095_v9  ;;  %v165_v19 = vld [vmem:[%s3499_s5 + $0x8] sm:$0xff] }
 0x390   :  { %v458_v24 = vadd.f32 %v447_v22, %v3097_v12  ;;  %v2598_v21 = vpack.c.bf16 %v165_v19, %v164_v18  ;;  %v166_v22 = vld [vmem:[%s3499_s5 + $0x10] sm:$0xff] }
 0x391   :  { %v469_v28 = vsel %vm281_vm3, %v459_v25, -inf }
 0x392   :  { %v466_v27 = vsel %vm281_vm3, %v458_v24, -inf  ;;  %2599 = vmatprep.subr.bf16.mxu0 %v2598_v21 }
 0x393   :  { %467 = vmax.xlane.f32.xlu0 %v466_v27  ;;  %2601 = vmatpush3.bf16.msra.mxu0 %v2598_v21 }
 0x397   :  { %470 = vmax.xlane.f32.xlu0 %v469_v28 }
 0x41b   :  { %v465_v29 = vpop.xlane.xlu1 %464 }
 0x41c   :  { %v473_v30 = vsub.f32 %v457_v0, %v465_v29  ;;  %v462_v31 = vpop.xlane.xlu0 %461 }
 0x41d   :  { %v472_v32 = vsub.f32 %v456_v16, %v462_v31 }
 0x41e   :  { %v478_v33 = vmul.f32 1.442695, %v473_v30 }
 0x41f   :  { %v476_v34 = vmul.f32 1.442695, %v472_v32 }
 0x420   :  { %2820 = vpow2.f32 %v478_v33  ;;  %v468_v35 = vpop.xlane.xlu0 %467 }
 0x421   :  { %2822 = vpow2.f32 %v476_v34  ;;  %v474_v36 = vsub.f32 %v458_v24, %v468_v35  ;;  %v167_v24 = vld [vmem:[%s3499_s5 + $0x18] sm:$0xff]  ;;  %v690_v35 = vsub.s32 1, %v3049_v43 }
 0x423   :  { %v480_v37 = vmul.f32 1.442695, %v474_v36  ;;  %v691_v36 = vrot.slane %v3057_v45, %v690_v35 }
 0x424   :  { %v471_v38 = vpop.xlane.xlu0 %470 }
 0x425   :  { %2824 = vpow2.f32 %v480_v37  ;;  %v475_v39 = vsub.f32 %v459_v25, %v471_v38  ;;  %v2602_v25 = vpack.c.bf16 %v167_v24, %v166_v22 }
 0x427   :  { %v482_v40 = vmul.f32 1.442695, %v475_v39  ;;  %2603 = vmatprep.subr.bf16.mxu0 %v2602_v25 }
 0x428   :  { %2605 = vmatpush3.bf16.msra.mxu0 %v2602_v25 }
 0x429   :  { %2826 = vpow2.f32 %v482_v40 }
 0x42a   :  { %v2821_v46 = vpop.eup %2820 }
 0x42b   :  { %v2823_v47 = vpop.eup %2822  ;;  %v487_v48 = vsel %vm281_vm3, %v2821_v46, 0.0 }
 0x42c   :  { %488 = vadd.xlane.f32.xlu0 %v487_v48  ;;  %v484_v49 = vsel %vm281_vm3, %v2823_v47, 0.0 }
 0x42d   :  { %485 = vadd.xlane.f32.xlu1 %v484_v49 }
 0x42f   :  { %v2825_v50 = vpop.eup %2824 }
 0x430   :  { %v490_v52 = vsel %vm281_vm3, %v2825_v50, 0.0 }
 0x431   :  { %491 = vadd.xlane.f32.xlu1 %v490_v52 }
 0x433   :  { %v2827_v53 = vpop.eup %2826 }
 0x434   :  { %v493_v54 = vsel %vm281_vm3, %v2827_v53, 0.0 }
 0x435   :  { %494 = vadd.xlane.f32.xlu0 %v493_v54 }
 0x442   :  { %2791 = vrot.lane.b32.xlu1 %v3063_v51, %s2882_s1 }
 0x44b   :  { %2796 = vrot.lane.b32.xlu0 %v3063_v51, %s2883_s16 }
 0x4b9   :  { %v489_v55 = vpop.xlane.xlu0 %488 }
 0x4ba   :  { %v486_v57 = vpop.xlane.xlu1 %485 }
 0x4bb   :  { %2828 = vrcp.f32 %v486_v57 }
 0x4bc   :  { %2830 = vrcp.f32 %v489_v55 }
 0x4be   :  { %v492_v58 = vpop.xlane.xlu1 %491 }
 0x4bf   :  { %2832 = vrcp.f32 %v492_v58 }
 0x4c2   :  { %v2792_v59 = vpop.permute.xlu1 %2791  ;;  %v495_v60 = vpop.xlane.xlu0 %494 }
 0x4c3   :  { %v2794_v61 = vunpack.i.h.bf16 %v2792_v59  ;;  %v2793_v62 = vunpack.i.l.bf16 %v2792_v59  ;;  %2834 = vrcp.f32 %v495_v60 }
 0x4c5   :  { %v2829_v63 = vpop.eup %2828  ;;  %v2590_v1 = vpack.c.bf16 %v2794_v61, %v2793_v62  ;;  %v169_v61 = vld [vmem:[%s3500_s6 + $0x8] sm:$0xff] }
 0x4c6   :  { %v2831_v2 = vpop.eup %2830  ;;  %v2797_v3 = vpop.permute.xlu0 %2796  ;;  %v500_v4 = vmul.f32 %v2829_v63, %v2823_v47  ;;  %v170_v63 = vld [vmem:[%s3500_s6 + $0x10] sm:$0xff] }
 0x4c7   :  { %v2799_v5 = vunpack.i.h.bf16 %v2797_v3  ;;  %v2798_v7 = vunpack.i.l.bf16 %v2797_v3  ;;  %2591 = vmatprep.subr.bf16.mxu1 %v2590_v1  ;;  %v501_v8 = vmul.f32 %v2831_v2, %v2821_v46 }
 0x4c8   :  { %2593 = vmatpush3.bf16.msra.mxu1 %v2590_v1  ;;  %2340 = vmatprep.mubr.msk.f32.mxu1 %vm281_vm3, %v500_v4  ;;  %v171_v1 = vld [vmem:[%s3500_s6 + $0x18] sm:$0xff] }
 0x4c9   :  { %v2833_v51 = vpop.eup %2832  ;;  %v2594_v13 = vpack.c.bf16 %v2799_v5, %v2798_v7  ;;  %v2610_v2 = vpack.c.bf16 %v171_v1, %v170_v63 }
 0x4ca   :  { %v502_v0 = vmul.f32 %v2833_v51, %v2825_v50 }
 0x4cb   :  { %2341 = vmatmul.mubr.msk.f32.vlgmr.msra.gmra.mrb[2].mxu1 %vm281_vm3, %v501_v8  ;;  %2595 = vmatprep.subr.bf16.mxu1 %v2594_v13 }
 0x4cc   :  { %2597 = vmatpush3.bf16.msra.mxu1 %v2594_v13  ;;  %2347 = vmatprep.mubr.msk.f32.mxu1 %vm281_vm3, %v502_v0  ;;  %v804_v13 = vsub.s32 2, %v3049_v43  ;;  %v810_v0 = vsub.s32 3, %v3049_v43 }
 0x4cd   :  { %v2835_v15 = vpop.eup %2834 }
 0x4ce   :  { %v503_v16 = vmul.f32 %v2835_v15, %v2827_v53  ;;  %v805_v15 = vrot.slane %v3057_v45, %v804_v13  ;;  %v811_v19 = vrot.slane %v3057_v45, %v810_v0 }
 0x4d0   :  { %2348 = vmatmul.mubr.msk.f32.vlgmr.msra.gmra.mrb[4].mxu1 %vm281_vm3, %v503_v16 }
 0x59e   :  { %v2342_v27 = vpop.f32.mrb[2].mxu1 }
 0x59f   :  { %v582_v28 = vpop.f32.mrb[3].mxu1 }
 0x5a3   :  { %v2349_v29 = vpop.f32.mrb[4].mxu1 }
 0x5a4   :  { %v669_v30 = vpop.f32.mrb[5].mxu1 }
 0x5a5   :  { %680 = vrot.lane.b32.xlu1 %v669_v30, %s2884_s0  ;;  %v173_v30 = vld [vmem:[%s3501_s7 + $0x8] sm:$0xff] }
 0x5a9   :  { %682 = vrot.lane.b32.xlu1 %v2349_v29, %s2884_s0  ;;  %v172_v29 = vld [vmem:[%s3501_s7] sm:$0xff] }
 0x617   :  { %v681_v31 = vpop.permute.xlu1 %680 }
 0x618   :  { %v686_v32 = vsel %vm281_vm3, %v582_v28, %v681_v31  ;;  %v2614_v31 = vpack.c.bf16 %v173_v30, %v172_v29 }
 0x619   :  { %2358 = vmatprep.mubr.msk.f32.mxu0 %vm193_vm2, %v686_v32  ;;  %v174_v32 = vld [vmem:[%s3501_s7 + $0x10] sm:$0xff] }
 0x61a   :  { %2615 = vmatprep.subr.bf16.mxu0 %v2614_v31 }
 0x61b   :  { %v683_v33 = vpop.permute.xlu1 %682 }
 0x61c   :  { %v687_v34 = vsel %vm281_vm3, %v2342_v27, %v683_v33  ;;  %v175_v33 = vld [vmem:[%s3501_s7 + $0x18] sm:$0xff] }
 0x61d   :  { %2359 = vmatmul.mubr.msk.f32.vlgmr.msra.gmra.mrb[6].mxu0 %vm193_vm2, %v687_v34  ;;  %v2618_v34 = vpack.c.bf16 %v175_v33, %v174_v32  ;;  %v919_v32 = vsub.s32 5, %v3049_v43 }
 0x61e   :  { %2617 = vmatpush3.bf16.msra.mxu0 %v2614_v31 }
 0x61f   :  { %2619 = vmatprep.subr.bf16.mxu0 %v2618_v34  ;;  %v920_v33 = vrot.slane %v3057_v45, %v919_v32 }
 0x622   :  { %2621 = vmatpush3.bf16.msra.mxu0 %v2618_v34 }
 0x6f0   :  { %v2360_v37 = vpop.f32.mrb[6].mxu0 }
 0x6f1   :  { %v770_v38 = vadd.f32 %v2360_v37, %v691_v36  ;;  %v764_v39 = vpop.f32.mrb[7].mxu0  ;;  %v177_v37 = vld [vmem:[%s3501_s7 + $0x28] sm:$0xff] }
 0x6f2   :  { %v765_v40 = vadd.f32 %v764_v39, %v691_v36  ;;  %v176_v36 = vld [vmem:[%s3501_s7 + $0x20] sm:$0xff]  ;;  %v178_v39 = vld [vmem:[%s3501_s7 + $0x30] sm:$0xff] }
 0x6f3   :  { %v774_v46 = vadd.f32 %v770_v38, %v3043_v42  ;;  %v2622_v38 = vpack.c.bf16 %v177_v37, %v176_v36 }
 0x6f4   :  { %v773_v47 = vadd.f32 %v765_v40, %v3041_v41  ;;  %v168_v41 = vld [vmem:[%s3500_s6] sm:$0xff]  ;;  %v179_v40 = vld [vmem:[%s3501_s7 + $0x38] sm:$0xff] }
 0x6f5   :  { %v778_v48 = vsel %vm193_vm2, %v774_v46, 0.0  ;;  %v2606_v62 = vpack.c.bf16 %v169_v61, %v168_v41  ;;  %2623 = vmatprep.subr.bf16.mxu0 %v2622_v38 }
 0x6f6   :  { %779 = vadd.xlane.f32.xlu1 %v778_v48  ;;  %v775_v49 = vsel %vm193_vm2, %v773_v47, 0.0  ;;  %2625 = vmatpush3.bf16.msra.mxu0 %v2622_v38  ;;  %v181_v48 = vld [vmem:[%s3501_s7 + $0x48] sm:$0xff] }
 0x6f7   :  { %776 = vadd.xlane.f32.xlu0 %v775_v49  ;;  %2607 = vmatprep.subr.bf16.mxu1 %v2606_v62  ;;  %v182_v49 = vld [vmem:[%s3501_s7 + $0x50] sm:$0xff] }
 0x6f8   :  { %2609 = vmatpush3.bf16.msra.mxu1 %v2606_v62 }
 0x6f9   :  { %2611 = vmatprep.subr.bf16.mxu1 %v2610_v2 }
 0x6fc   :  { %2613 = vmatpush3.bf16.msra.mxu1 %v2610_v2 }
 0x783   :  { %v780_v50 = vpop.xlane.xlu1 %779 }
 0x784   :  { %v783_v52 = vmul.f32 0.03125, %v780_v50  ;;  %v777_v53 = vpop.xlane.xlu0 %776 }
 0x785   :  { %v782_v54 = vmul.f32 0.03125, %v777_v53 }
 0x786   :  { %v785_v55 = vsub.f32 %v774_v46, %v783_v52  ;;  %v2626_v46 = vpack.c.bf16 %v179_v40, %v178_v39  ;;  %v183_v52 = vld [vmem:[%s3501_s7 + $0x58] sm:$0xff] }
 0x787   :  { %v784_v57 = vsub.f32 %v773_v47, %v782_v54  ;;  %v180_v47 = vld [vmem:[%s3501_s7 + $0x40] sm:$0xff]  ;;  %v2634_v53 = vpack.c.bf16 %v183_v52, %v182_v49 }
 0x788   :  { %v787_v60 = vmul.f32 %v785_v55, %v785_v55  ;;  %2627 = vmatprep.subr.bf16.mxu0 %v2626_v46  ;;  %v2630_v50 = vpack.c.bf16 %v181_v48, %v180_v47  ;;  %v184_v54 = vld [vmem:[%s3501_s7 + $0x60] sm:$0xff] }
 0x789   :  { %v786_v58 = vmul.f32 %v784_v57, %v784_v57  ;;  %2629 = vmatpush3.bf16.msra.mxu0 %v2626_v46 }
 0x78a   :  { %v791_v42 = vsel %vm193_vm2, %v787_v60, 0.0  ;;  %2631 = vmatprep.subr.bf16.mxu0 %v2630_v50 }
 0x78b   :  { %v788_v59 = vsel %vm193_vm2, %v786_v58, 0.0  ;;  %v186_v58 = vld [vmem:[%s3501_s7 + $0x70] sm:$0xff] }
 0x78c   :  { %789 = vadd.xlane.f32.xlu0 %v788_v59  ;;  %v187_v59 = vld [vmem:[%s3501_s7 + $0x78] sm:$0xff] }
 0x78d   :  { %2633 = vmatpush3.bf16.msra.mxu0 %v2630_v50  ;;  %v2642_v60 = vpack.c.bf16 %v187_v59, %v186_v58  ;;  %v2072_v59 = vld [vmem:[%s3495_s4 + $0x28] sm:$0xff] }
 0x78e   :  { %2635 = vmatprep.subr.bf16.mxu0 %v2634_v53 }
 0x790   :  { %792 = vadd.xlane.f32.xlu0 %v791_v42  ;;  %v816_v42 = vsub.s32 4, %v3049_v43 }
 0x791   :  { %2637 = vmatpush3.bf16.msra.mxu0 %v2634_v53 }
 0x792   :  { %v817_v41 = vrot.slane %v3057_v45, %v816_v42 }
 0x819   :  { %v790_v3 = vpop.xlane.xlu0 %789 }
 0x81a   :  { %v794_v4 = vmul.f32 0.03125, %v790_v3 }
 0x81c   :  { %v796_v5 = vadd.f32 1e-05, %v794_v4 }
 0x81d   :  { %v793_v7 = vpop.xlane.xlu0 %792 }
 0x81e   :  { %2836 = vrsqrt.f32 %v796_v5  ;;  %v795_v51 = vmul.f32 0.03125, %v793_v7 }
 0x820   :  { %v797_v8 = vadd.f32 1e-05, %v795_v51 }
 0x822   :  { %2838 = vrsqrt.f32 %v797_v8 }
 0x828   :  { %v2837_v16 = vpop.eup %2836 }
 0x829   :  { %v800_v18 = vmul.f32 %v2837_v16, %v784_v57 }
 0x82b   :  { %v806_v21 = vmul.f32 %v805_v15, %v800_v18 }
 0x82c   :  { %v2839_v22 = vpop.eup %2838 }
 0x82d   :  { %v801_v24 = vmul.f32 %v2839_v22, %v785_v55  ;;  %v3167_v25 = vadd.f32 %v811_v19, %v806_v21  ;;  %v185_v55 = vld [vmem:[%s3501_s7 + $0x68] sm:$0xff] }
 0x82e   :  { %v2638_v57 = vpack.c.bf16 %v185_v55, %v184_v54 }
 0x82f   :  { %v807_v27 = vmul.f32 %v805_v15, %v801_v24  ;;  %2369 = vmatprep.mubr.msk.f32.mxu1 %vm193_vm2, %v3167_v25 }
 0x830   :  { %2639 = vmatprep.subr.bf16.mxu0 %v2638_v57 }
 0x831   :  { %v3171_v28 = vadd.f32 %v811_v19, %v807_v27  ;;  %2641 = vmatpush3.bf16.msra.mxu0 %v2638_v57 }
 0x832   :  { %2643 = vmatprep.subr.bf16.mxu0 %v2642_v60 }
 0x833   :  { %2370 = vmatmul.mubr.msk.f32.vlgmr.msra.gmra.mrb[6].mxu1 %vm193_vm2, %v3171_v28 }
 0x835   :  { %2645 = vmatpush3.bf16.msra.mxu0 %v2642_v60 }
 0x906   :  { %v2371_v61 = vpop.f32.mrb[6].mxu1 }
 0x907   :  { %v896_v62 = vadd.f32 %v2371_v61, %v817_v41  ;;  %v890_v63 = vpop.f32.mrb[7].mxu1  ;;  %v2074_v61 = vld [vmem:[%s3495_s4 + $0x38] sm:$0xff] }
 0x908   :  { %v891_v1 = vadd.f32 %v890_v63, %v817_v41  ;;  %v2073_v41 = vld [vmem:[%s3495_s4 + $0x30] sm:$0xff] }
 0x909   :  { %v900_v2 = vmul.f32 %v896_v62, %v896_v62 }
 0x90a   :  { %v899_v3 = vmul.f32 %v891_v1, %v891_v1 }
 0x90b   :  { %v902_v4 = vmul.f32 %v900_v2, %v896_v62 }
 0x90c   :  { %v901_v5 = vmul.f32 %v899_v3, %v891_v1 }
 0x90d   :  { %v904_v7 = vmul.f32 0.044715, %v902_v4 }
 0x90e   :  { %v903_v51 = vmul.f32 0.044715, %v901_v5 }
 0x90f   :  { %v906_v8 = vadd.f32 %v904_v7, %v896_v62  ;;  %v1026_v7 = vsub.s32 6, %v3049_v43 }
 0x910   :  { %v905_v15 = vadd.f32 %v903_v51, %v891_v1  ;;  %v1032_v51 = vsub.s32 7, %v3049_v43 }
 0x911   :  { %v908_v16 = vmul.f32 0.7978846, %v906_v8  ;;  %v1027_v8 = vrot.slane %v3057_v45, %v1026_v7 }
 0x912   :  { %v907_v18 = vmul.f32 0.7978846, %v905_v15 }
 0x913   :  { %2840 = vtanh.f32 %v908_v16 }
 0x914   :  { %2842 = vtanh.f32 %v907_v18 }
 0x91d   :  { %v2841_v19 = vpop.eup %2840 }
 0x91e   :  { %v2843_v21 = vpop.eup %2842  ;;  %v912_v22 = vadd.f32 1.0, %v2841_v19 }
 0x91f   :  { %v911_v24 = vadd.f32 1.0, %v2843_v21  ;;  %v1033_v21 = vrot.slane %v3057_v45, %v1032_v51 }
 0x920   :  { %v914_v27 = vmul.f32 0.5, %v912_v22 }
 0x921   :  { %v913_v29 = vmul.f32 0.5, %v911_v24 }
 0x922   :  { %v916_v31 = vmul.f32 %v914_v27, %v896_v62  ;;  %v2650_v62 = vpack.c.bf16 %v2074_v61, %v2073_v41 }
 0x923   :  { %v915_v30 = vmul.f32 %v913_v29, %v891_v1 }
 0x925   :  { %2404 = vmatprep.mubr.f32.mxu0 %v915_v30  ;;  %v3268_v30 = vld [vmem:[%s3497_s8 + $0x8] sm:$0xff] }
 0x926   :  { %2405 = vmatmul.mubr.f32.vlgmr.msra.gmra.mrb[8].mxu0 %v916_v31  ;;  %v1073_v45 = vrot.slane %v3268_v30, %v3052_v44 }
 0x9f9   :  { %v2406_v34 = vpop.f32.mrb[8].mxu0 }
 0x9fa   :  { %v993_v36 = vadd.f32 %v2406_v34, %v920_v33  ;;  %v987_v37 = vpop.f32.mrb[9].mxu0 }
 0x9fb   :  { %v988_v38 = vadd.f32 %v987_v37, %v920_v33 }
 0x9fc   :  { %v997_v39 = vadd.f32 %v993_v36, %v3171_v28 }
 0x9fd   :  { %v996_v40 = vadd.f32 %v988_v38, %v3167_v25  ;;  %v2071_v25 = vld [vmem:[%s3495_s4 + $0x20] sm:$0xff] }
 0x9fe   :  { %v1001_v46 = vsel %vm193_vm2, %v997_v39, 0.0  ;;  %v2646_v60 = vpack.c.bf16 %v2072_v59, %v2071_v25 }
 0x9ff   :  { %1002 = vadd.xlane.f32.xlu0 %v1001_v46  ;;  %v998_v47 = vsel %vm193_vm2, %v996_v40, 0.0 }
 0xa00   :  { %999 = vadd.xlane.f32.xlu1 %v998_v47  ;;  %2647 = vmatprep.subr.bf16.mxu1 %v2646_v60 }
 0xa01   :  { %2649 = vmatpush3.bf16.msra.mxu1 %v2646_v60 }
 0xa02   :  { %2651 = vmatprep.subr.bf16.mxu1 %v2650_v62 }
 0xa05   :  { %2653 = vmatpush3.bf16.msra.mxu1 %v2650_v62 }
 0xa8c   :  { %v1003_v48 = vpop.xlane.xlu0 %1002 }
 0xa8d   :  { %v1005_v49 = vmul.f32 0.03125, %v1003_v48  ;;  %v1000_v50 = vpop.xlane.xlu1 %999 }
 0xa8e   :  { %v1004_v52 = vmul.f32 0.03125, %v1000_v50 }
 0xa8f   :  { %v1007_v53 = vsub.f32 %v997_v39, %v1005_v49 }
 0xa90   :  { %v1006_v54 = vsub.f32 %v996_v40, %v1004_v52 }
 0xa91   :  { %v1009_v55 = vmul.f32 %v1007_v53, %v1007_v53 }
 0xa92   :  { %v1008_v57 = vmul.f32 %v1006_v54, %v1006_v54 }
 0xa93   :  { %v1013_v58 = vsel %vm193_vm2, %v1009_v55, 0.0 }
 0xa94   :  { %1014 = vadd.xlane.f32.xlu0 %v1013_v58  ;;  %v1010_v28 = vsel %vm193_vm2, %v1008_v57, 0.0 }
 0xa95   :  { %1011 = vadd.xlane.f32.xlu1 %v1010_v28 }
 0xb21   :  { %v1015_v63 = vpop.xlane.xlu0 %1014 }
 0xb22   :  { %v1017_v1 = vmul.f32 0.03125, %v1015_v63  ;;  %v1012_v2 = vpop.xlane.xlu1 %1011 }
 0xb23   :  { %v1016_v3 = vmul.f32 0.03125, %v1012_v2 }
 0xb24   :  { %v1019_v4 = vadd.f32 1e-05, %v1017_v1 }
 0xb25   :  { %v1018_v5 = vadd.f32 1e-05, %v1016_v3 }
 0xb26   :  { %2844 = vrsqrt.f32 %v1019_v4 }
 0xb27   :  { %2846 = vrsqrt.f32 %v1018_v5 }
 0xb30   :  { %v2845_v15 = vpop.eup %2844 }
 0xb31   :  { %v2847_v16 = vpop.eup %2846  ;;  %v1023_v18 = vmul.f32 %v2845_v15, %v1007_v53 }
 0xb32   :  { %v1022_v19 = vmul.f32 %v2847_v16, %v1006_v54 }
 0xb33   :  { %v1029_v22 = vmul.f32 %v1027_v8, %v1023_v18 }
 0xb34   :  { %v1028_v24 = vmul.f32 %v1027_v8, %v1022_v19 }
 0xb35   :  { %v3259_v29 = vadd.f32 %v1033_v21, %v1029_v22 }
 0xb36   :  { %v3257_v27 = vadd.f32 %v1033_v21, %v1028_v24 }
 0xb38   :  { %2415 = vmatprep.mubr.msk.f32.mxu1 %vm193_vm2, %v3257_v27 }
 0xb39   :  { %2416 = vmatmul.mubr.msk.f32.vlgmr.msra.gmra.mrb[8].mxu1 %vm193_vm2, %v3259_v29 }
 0xc0c   :  { %v2417_v31 = vpop.f32.mrb[8].mxu1 }
 0xc0d   :  { %v1152_v33 = vadd.f32 %v2417_v31, %v1073_v45  ;;  %v1146_v34 = vpop.f32.mrb[9].mxu1 }
 0xc0e   :  { %v1147_v36 = vadd.f32 %v1146_v34, %v1073_v45 }
 0xc10   :  { %2422 = vmatprep.mubr.msk.f32.mxu1 %vm281_vm3, %v1147_v36  ;;  %v3273_v37 = vpack.i.bf16 %v1152_v33, %v1147_v36 }
 0xc12   :  { %2806 = vrot.lane.b32.xlu0 %v3273_v37, %s2880_s13  ;;  %2801 = vrot.lane.b32.xlu1 %v3273_v37, %s2879_s12 }
 0xc16   :  { %1244 = vrot.lane.b32.xlu1 %v1147_v36, %s2878_s11 }
 0xc1a   :  { %1246 = vrot.lane.b32.xlu1 %v1152_v33, %s2878_s11 }
 0xc84   :  { %v2807_v38 = vpop.permute.xlu0 %2806  ;;  %v2802_v44 = vpop.permute.xlu1 %2801 }
 0xc85   :  { %v2809_v39 = vunpack.i.h.bf16 %v2807_v38  ;;  %v2808_v40 = vunpack.i.l.bf16 %v2807_v38  ;;  %v2804_v46 = vunpack.i.h.bf16 %v2802_v44  ;;  %v2803_v47 = vunpack.i.l.bf16 %v2802_v44 }
 0xc87   :  { %v2654_v48 = vpack.c.bf16 %v2804_v46, %v2803_v47  ;;  %v2660_v49 = vpack.c.bf16 %v2809_v39, %v2808_v40 }
 0xc88   :  { %v1245_v50 = vpop.permute.xlu1 %1244 }
 0xc89   :  { %2656 = vmatprep.subr.msk.bf16.mxu1 %vm3073_vm4, %v2654_v48 }
 0xc8a   :  { %2659 = vmatpush3.bf16.xpose.msk.msra.mxu1 %vm3073_vm4, %v2654_v48 }
 0xc8b   :  { %2662 = vmatprep.subr.msk.bf16.mxu1 %vm3073_vm4, %v2660_v49 }
 0xc8c   :  { %v1247_v52 = vpop.permute.xlu1 %1246 }
 0xc91   :  { %2423 = vmatmul.mubr.msk.f32.vlgmr.msra.gmra.mrb[10].mxu1 %vm281_vm3, %v1152_v33 }
 0xc92   :  { %2665 = vmatpush3.bf16.xpose.msk.msra.mxu1 %vm3073_vm4, %v2660_v49  ;;  %2429 = vmatprep.mubr.msk.f32.mxu1 %vm281_vm3, %v1245_v50 }
 0xc99   :  { %2430 = vmatmul.mubr.msk.f32.vlgmr.msra.gmra.mrb[12].mxu1 %vm281_vm3, %v1247_v52 }
 0xd64   :  { %v2424_v53 = vpop.f32.mrb[10].mxu1 }
 0xd65   :  { %v1336_v54 = vadd.f32 %v2424_v53, %v3095_v9  ;;  %v1235_v55 = vpop.f32.mrb[11].mxu1 }
 0xd66   :  { %v1335_v57 = vadd.f32 %v1235_v55, %v3097_v12 }
 0xd67   :  { %v1342_v58 = vsel %vm281_vm3, %v1336_v54, -inf }
 0xd68   :  { %1343 = vmax.xlane.f32.xlu1 %v1342_v58  ;;  %v1339_v28 = vsel %vm281_vm3, %v1335_v57, -inf }
 0xd69   :  { %1340 = vmax.xlane.f32.xlu0 %v1339_v28 }
 0xd6c   :  { %v2431_v25 = vpop.f32.mrb[12].mxu1 }
 0xd6d   :  { %v1326_v56 = vpop.f32.mrb[13].mxu1  ;;  %v1338_v60 = vadd.f32 %v2431_v25, %v3095_v9 }
 0xd6e   :  { %v1337_v59 = vadd.f32 %v1326_v56, %v3097_v12  ;;  %v2075_v56 = vld [vmem:[%s3499_s5 + $0x20] sm:$0xff] }
 0xd6f   :  { %v1348_v61 = vsel %vm281_vm3, %v1338_v60, -inf }
 0xd70   :  { %v1345_v41 = vsel %vm281_vm3, %v1337_v59, -inf }
 0xd71   :  { %1346 = vmax.xlane.f32.xlu0 %v1345_v41  ;;  %v2077_v41 = vld [vmem:[%s3499_s5 + $0x30] sm:$0xff] }
 0xd75   :  { %1349 = vmax.xlane.f32.xlu0 %v1348_v61  ;;  %v2078_v61 = vld [vmem:[%s3499_s5 + $0x38] sm:$0xff] }
 0xdf5   :  { %v1344_v62 = vpop.xlane.xlu1 %1343 }
 0xdf6   :  { %v1352_v63 = vsub.f32 %v1336_v54, %v1344_v62  ;;  %v1341_v1 = vpop.xlane.xlu0 %1340  ;;  %v2678_v62 = vpack.c.bf16 %v2078_v61, %v2077_v41 }
 0xdf7   :  { %v1351_v2 = vsub.f32 %v1335_v57, %v1341_v1 }
 0xdf8   :  { %v1357_v3 = vmul.f32 1.442695, %v1352_v63 }
 0xdf9   :  { %v1355_v4 = vmul.f32 1.442695, %v1351_v2 }
 0xdfa   :  { %2848 = vpow2.f32 %v1357_v3 }
 0xdfb   :  { %2850 = vpow2.f32 %v1355_v4 }
 0xdfe   :  { %v1347_v5 = vpop.xlane.xlu0 %1346 }
 0xdff   :  { %v1353_v8 = vsub.f32 %v1337_v59, %v1347_v5  ;;  %v2076_v59 = vld [vmem:[%s3499_s5 + $0x28] sm:$0xff] }
 0xe01   :  { %v1359_v15 = vmul.f32 1.442695, %v1353_v8 }
 0xe02   :  { %v1350_v12 = vpop.xlane.xlu0 %1349 }
 0xe03   :  { %2852 = vpow2.f32 %v1359_v15  ;;  %v1354_v9 = vsub.f32 %v1338_v60, %v1350_v12  ;;  %v2674_v60 = vpack.c.bf16 %v2076_v59, %v2075_v56  ;;  %v1570_v12 = vrot.slane %v3268_v30, %v690_v35 }
 0xe04   :  { %v2849_v16 = vpop.eup %2848  ;;  %v1689_v56 = vrot.slane %v3268_v30, %v810_v0  ;;  %v2084_v0 = vld [vmem:[%s3501_s7 + $0x88] sm:$0xff] }
 0xe05   :  { %v2851_v18 = vpop.eup %2850  ;;  %v1361_v19 = vmul.f32 1.442695, %v1354_v9  ;;  %v1366_v21 = vsel %vm281_vm3, %v2849_v16, 0.0  ;;  %2675 = vmatprep.subr.bf16.mxu0 %v2674_v60 }
 0xe06   :  { %1367 = vadd.xlane.f32.xlu0 %v1366_v21  ;;  %v1363_v22 = vsel %vm281_vm3, %v2851_v18, 0.0  ;;  %2677 = vmatpush3.bf16.msra.mxu0 %v2674_v60 }
 0xe07   :  { %2854 = vpow2.f32 %v1361_v19  ;;  %1364 = vadd.xlane.f32.xlu1 %v1363_v22  ;;  %2679 = vmatprep.subr.bf16.mxu0 %v2678_v62 }
 0xe0a   :  { %2681 = vmatpush3.bf16.msra.mxu0 %v2678_v62 }
 0xe0d   :  { %v2853_v24 = vpop.eup %2852 }
 0xe0e   :  { %v1369_v45 = vsel %vm281_vm3, %v2853_v24, 0.0 }
 0xe0f   :  { %1370 = vadd.xlane.f32.xlu1 %v1369_v45 }
 0xe11   :  { %v2855_v31 = vpop.eup %2854 }
 0xe12   :  { %v1372_v33 = vsel %vm281_vm3, %v2855_v31, 0.0 }
 0xe13   :  { %1373 = vadd.xlane.f32.xlu0 %v1372_v33 }
 0xe20   :  { %2811 = vrot.lane.b32.xlu1 %v3273_v37, %s2882_s1 }
 0xe29   :  { %2816 = vrot.lane.b32.xlu0 %v3273_v37, %s2883_s16 }
 0xe93   :  { %v1368_v36 = vpop.xlane.xlu0 %1367 }
 0xe94   :  { %v1365_v34 = vpop.xlane.xlu1 %1364 }
 0xe95   :  { %2856 = vrcp.f32 %v1365_v34 }
 0xe96   :  { %2858 = vrcp.f32 %v1368_v36 }
 0xe9c   :  { %v1371_v38 = vpop.xlane.xlu1 %1370 }
 0xe9d   :  { %2860 = vrcp.f32 %v1371_v38 }
 0xe9f   :  { %v2857_v44 = vpop.eup %2856 }
 0xea0   :  { %v2812_v39 = vpop.permute.xlu1 %2811  ;;  %v1374_v40 = vpop.xlane.xlu0 %1373  ;;  %v1379_v46 = vmul.f32 %v2857_v44, %v2851_v18 }
 0xea1   :  { %v2814_v47 = vunpack.i.h.bf16 %v2812_v39  ;;  %v2813_v48 = vunpack.i.l.bf16 %v2812_v39  ;;  %2862 = vrcp.f32 %v1374_v40  ;;  %v2859_v50 = vpop.eup %2858 }
 0xea2   :  { %2436 = vmatprep.mubr.msk.f32.mxu1 %vm281_vm3, %v1379_v46  ;;  %v1380_v55 = vmul.f32 %v2859_v50, %v2849_v16  ;;  %v2080_v46 = vld [vmem:[%s3500_s6 + $0x28] sm:$0xff] }
 0xea3   :  { %v2666_v49 = vpack.c.bf16 %v2814_v47, %v2813_v48  ;;  %v2081_v48 = vld [vmem:[%s3500_s6 + $0x30] sm:$0xff] }
 0xea4   :  { %v2817_v52 = vpop.permute.xlu0 %2816 }
 0xea5   :  { %v2819_v53 = vunpack.i.h.bf16 %v2817_v52  ;;  %v2818_v37 = vunpack.i.l.bf16 %v2817_v52  ;;  %2667 = vmatprep.subr.bf16.mxu1 %v2666_v49 }
 0xea6   :  { %2669 = vmatpush3.bf16.msra.mxu1 %v2666_v49  ;;  %v2082_v49 = vld [vmem:[%s3500_s6 + $0x38] sm:$0xff] }
 0xea7   :  { %v2861_v54 = vpop.eup %2860  ;;  %v2670_v57 = vpack.c.bf16 %v2819_v53, %v2818_v37  ;;  %v2686_v50 = vpack.c.bf16 %v2082_v49, %v2081_v48 }
 0xea8   :  { %v1381_v58 = vmul.f32 %v2861_v54, %v2853_v24 }
 0xea9   :  { %2437 = vmatmul.mubr.msk.f32.vlgmr.msra.gmra.mrb[14].mxu1 %vm281_vm3, %v1380_v55  ;;  %2671 = vmatprep.subr.bf16.mxu1 %v2670_v57 }
 0xeaa   :  { %2673 = vmatpush3.bf16.msra.mxu1 %v2670_v57  ;;  %2443 = vmatprep.mubr.msk.f32.mxu1 %vm281_vm3, %v1381_v58  ;;  %v1683_v58 = vrot.slane %v3268_v30, %v804_v13  ;;  %v2083_v13 = vld [vmem:[%s3501_s7 + $0x80] sm:$0xff] }
 0xeab   :  { %v2863_v28 = vpop.eup %2862 }
 0xeac   :  { %v1382_v25 = vmul.f32 %v2863_v28, %v2855_v31 }
 0xeae   :  { %2444 = vmatmul.mubr.msk.f32.vlgmr.msra.gmra.mrb[16].mxu1 %vm281_vm3, %v1382_v25 }
 0xf7c   :  { %v2438_v63 = vpop.f32.mrb[14].mxu1 }
 0xf7d   :  { %v1461_v1 = vpop.f32.mrb[15].mxu1 }
 0xf81   :  { %v2445_v2 = vpop.f32.mrb[16].mxu1 }
 0xf82   :  { %v1548_v3 = vpop.f32.mrb[17].mxu1 }
 0xf83   :  { %1559 = vrot.lane.b32.xlu1 %v1548_v3, %s2884_s0  ;;  %v2086_v3 = vld [vmem:[%s3501_s7 + $0x98] sm:$0xff] }
 0xf87   :  { %1561 = vrot.lane.b32.xlu1 %v2445_v2, %s2884_s0  ;;  %v2085_v2 = vld [vmem:[%s3501_s7 + $0x90] sm:$0xff] }
 0xff5   :  { %v1560_v4 = vpop.permute.xlu1 %1559 }
 0xff6   :  { %v1565_v5 = vsel %vm281_vm3, %v1461_v1, %v1560_v4  ;;  %v2690_v1 = vpack.c.bf16 %v2084_v0, %v2083_v13  ;;  %v2694_v4 = vpack.c.bf16 %v2086_v3, %v2085_v2 }
 0xff7   :  { %2454 = vmatprep.mubr.msk.f32.mxu0 %vm193_vm2, %v1565_v5  ;;  %v2087_v5 = vld [vmem:[%s3501_s7 + $0xa0] sm:$0xff] }
 0xff8   :  { %2691 = vmatprep.subr.bf16.mxu0 %v2690_v1 }
 0xff9   :  { %v1562_v8 = vpop.permute.xlu1 %1561 }
 0xffa   :  { %v1566_v15 = vsel %vm281_vm3, %v2438_v63, %v1562_v8  ;;  %v2088_v8 = vld [vmem:[%s3501_s7 + $0xa8] sm:$0xff] }
 0xffb   :  { %2455 = vmatmul.mubr.msk.f32.vlgmr.msra.gmra.mrb[10].mxu0 %vm193_vm2, %v1566_v15  ;;  %v2698_v15 = vpack.c.bf16 %v2088_v8, %v2087_v5 }
 0xffc   :  { %2693 = vmatpush3.bf16.msra.mxu0 %v2690_v1 }
 0xffd   :  { %2695 = vmatprep.subr.bf16.mxu0 %v2694_v4 }
0x1000   :  { %2697 = vmatpush3.bf16.msra.mxu0 %v2694_v4 }
0x1001   :  { %2699 = vmatprep.subr.bf16.mxu0 %v2698_v15 }
0x1004   :  { %2701 = vmatpush3.bf16.msra.mxu0 %v2698_v15 }
0x10ce   :  { %v2456_v9 = vpop.f32.mrb[10].mxu0 }
0x10cf   :  { %v1649_v16 = vadd.f32 %v2456_v9, %v1570_v12  ;;  %v1643_v18 = vpop.f32.mrb[11].mxu0  ;;  %v2090_v9 = vld [vmem:[%s3501_s7 + $0xb8] sm:$0xff] }
0x10d0   :  { %v1644_v19 = vadd.f32 %v1643_v18, %v1570_v12  ;;  %v2089_v12 = vld [vmem:[%s3501_s7 + $0xb0] sm:$0xff]  ;;  %v2091_v18 = vld [vmem:[%s3501_s7 + $0xc0] sm:$0xff] }
0x10d1   :  { %v1653_v21 = vadd.f32 %v1649_v16, %v3259_v29  ;;  %v2702_v16 = vpack.c.bf16 %v2090_v9, %v2089_v12 }
0x10d2   :  { %v1652_v22 = vadd.f32 %v1644_v19, %v3257_v27  ;;  %v2079_v27 = vld [vmem:[%s3500_s6 + $0x20] sm:$0xff]  ;;  %v2092_v19 = vld [vmem:[%s3501_s7 + $0xc8] sm:$0xff] }
0x10d3   :  { %v1657_v24 = vsel %vm193_vm2, %v1653_v21, 0.0  ;;  %v2682_v47 = vpack.c.bf16 %v2080_v46, %v2079_v27  ;;  %2703 = vmatprep.subr.bf16.mxu0 %v2702_v16 }
0x10d4   :  { %1658 = vadd.xlane.f32.xlu1 %v1657_v24  ;;  %v1654_v45 = vsel %vm193_vm2, %v1652_v22, 0.0  ;;  %2705 = vmatpush3.bf16.msra.mxu0 %v2702_v16  ;;  %v2094_v24 = vld [vmem:[%s3501_s7 + $0xd8] sm:$0xff] }
0x10d5   :  { %1655 = vadd.xlane.f32.xlu0 %v1654_v45  ;;  %2683 = vmatprep.subr.bf16.mxu1 %v2682_v47 }
0x10d6   :  { %2685 = vmatpush3.bf16.msra.mxu1 %v2682_v47 }
0x10d7   :  { %2687 = vmatprep.subr.bf16.mxu1 %v2686_v50 }
0x10da   :  { %2689 = vmatpush3.bf16.msra.mxu1 %v2686_v50 }
0x10db   :  { %2724 = vmatprep.subr.msk.bf16.mxu1 %vm3425_vm11, %v2951_v6 }
0x1161   :  { %v1659_v31 = vpop.xlane.xlu1 %1658 }
0x1162   :  { %v1661_v33 = vmul.f32 0.03125, %v1659_v31  ;;  %v1656_v34 = vpop.xlane.xlu0 %1655  ;;  %v2095_v31 = vld [vmem:[%s3501_s7 + $0xe0] sm:$0xff] }
0x1163   :  { %v1660_v36 = vmul.f32 0.03125, %v1656_v34 }
0x1164   :  { %v1663_v38 = vsub.f32 %v1653_v21, %v1661_v33  ;;  %v2093_v21 = vld [vmem:[%s3501_s7 + $0xd0] sm:$0xff]  ;;  %v2096_v33 = vld [vmem:[%s3501_s7 + $0xe8] sm:$0xff] }
0x1165   :  { %v1662_v35 = vsub.f32 %v1652_v22, %v1660_v36  ;;  %v2706_v22 = vpack.c.bf16 %v2092_v19, %v2091_v18  ;;  %v2710_v45 = vpack.c.bf16 %v2094_v24, %v2093_v21  ;;  %v2714_v34 = vpack.c.bf16 %v2096_v33, %v2095_v31  ;;  %v2097_v36 = vld [vmem:[%s3501_s7 + $0xf0] sm:$0xff] }
0x1166   :  { %v1665_v40 = vmul.f32 %v1663_v38, %v1663_v38  ;;  %v1905_v19 = vrot.slane %v3268_v30, %v1026_v7  ;;  %v1911_v31 = vrot.slane %v3268_v30, %v1032_v51 }
0x1167   :  { %v1664_v44 = vmul.f32 %v1662_v35, %v1662_v35  ;;  %2707 = vmatprep.subr.bf16.mxu0 %v2706_v22 }
0x1168   :  { %v1669_v29 = vsel %vm193_vm2, %v1665_v40, 0.0  ;;  %2709 = vmatpush3.bf16.msra.mxu0 %v2706_v22 }
0x1169   :  { %v1666_v39 = vsel %vm193_vm2, %v1664_v44, 0.0  ;;  %2711 = vmatprep.subr.bf16.mxu0 %v2710_v45  ;;  %v1695_v44 = vrot.slane %v3268_v30, %v816_v42 }
0x116a   :  { %1667 = vadd.xlane.f32.xlu0 %v1666_v39 }
0x116c   :  { %2713 = vmatpush3.bf16.msra.mxu0 %v2710_v45 }
0x116d   :  { %2715 = vmatprep.subr.bf16.mxu0 %v2714_v34 }
0x116e   :  { %1670 = vadd.xlane.f32.xlu0 %v1669_v29 }
0x1170   :  { %2717 = vmatpush3.bf16.msra.mxu0 %v2714_v34 }
0x11f7   :  { %v1668_v52 = vpop.xlane.xlu0 %1667 }
0x11f8   :  { %v1672_v53 = vmul.f32 0.03125, %v1668_v52 }
0x11fa   :  { %v1674_v37 = vadd.f32 1e-05, %v1672_v53 }
0x11fb   :  { %v1671_v54 = vpop.xlane.xlu0 %1670 }
0x11fc   :  { %2864 = vrsqrt.f32 %v1674_v37  ;;  %v1673_v55 = vmul.f32 0.03125, %v1671_v54 }
0x11fe   :  { %v1675_v57 = vadd.f32 1e-05, %v1673_v55 }
0x1200   :  { %2866 = vrsqrt.f32 %v1675_v57 }
0x1206   :  { %v2865_v28 = vpop.eup %2864 }
0x1207   :  { %v1678_v25 = vmul.f32 %v2865_v28, %v1662_v35 }
0x1209   :  { %v1684_v59 = vmul.f32 %v1683_v58, %v1678_v25 }
0x120a   :  { %v2867_v60 = vpop.eup %2866 }
0x120b   :  { %v1679_v41 = vmul.f32 %v2867_v60, %v1663_v38  ;;  %v3357_v61 = vadd.f32 %v1689_v56, %v1684_v59  ;;  %v2098_v38 = vld [vmem:[%s3501_s7 + $0xf8] sm:$0xff] }
0x120c   :  { %v2718_v35 = vpack.c.bf16 %v2098_v38, %v2097_v36 }
0x120d   :  { %v1685_v62 = vmul.f32 %v1683_v58, %v1679_v41  ;;  %2465 = vmatprep.mubr.msk.f32.mxu1 %vm193_vm2, %v3357_v61  ;;  %v1798_v41 = vrot.slane %v3268_v30, %v919_v32 }
0x120e   :  { %2719 = vmatprep.subr.bf16.mxu0 %v2718_v35 }
0x120f   :  { %v3361_v63 = vadd.f32 %v1689_v56, %v1685_v62  ;;  %2721 = vmatpush3.bf16.msra.mxu0 %v2718_v35 }
0x1211   :  { %2466 = vmatmul.mubr.msk.f32.vlgmr.msra.gmra.mrb[18].mxu1 %vm193_vm2, %v3361_v63 }
0x1212   :  { %2727 = vmatpush3.bf16.xpose.msk.msra.mxu1 %vm3425_vm11, %v2951_v6 }
0x1213   :  { %2730 = vmatprep.subr.msk.bf16.mxu1 %vm3425_vm11, %v2963_v10 }
0x121a   :  { %2733 = vmatpush3.bf16.xpose.msk.msra.mxu1 %vm3425_vm11, %v2963_v10 }
0x121b   :  { %2736 = vmatprep.subr.msk.bf16.mxu1 %vm3425_vm11, %v2967_v11 }
0x1222   :  { %2739 = vmatpush3.bf16.xpose.msk.msra.mxu1 %vm3425_vm11, %v2967_v11 }
0x1223   :  { %2742 = vmatprep.subr.msk.bf16.mxu1 %vm3425_vm11, %v2977_v14 }
0x122a   :  { %2745 = vmatpush3.bf16.xpose.msk.msra.mxu1 %vm3425_vm11, %v2977_v14 }
0x122b   :  { %2748 = vmatprep.subr.msk.bf16.mxu1 %vm3425_vm11, %v2987_v17 }
0x1232   :  { %2751 = vmatpush3.bf16.xpose.msk.msra.mxu1 %vm3425_vm11, %v2987_v17 }
0x1233   :  { %2754 = vmatprep.subr.msk.bf16.mxu1 %vm3425_vm11, %v2997_v20 }
0x123a   :  { %2757 = vmatpush3.bf16.xpose.msk.msra.mxu1 %vm3425_vm11, %v2997_v20 }
0x123b   :  { %2760 = vmatprep.subr.msk.bf16.mxu1 %vm3425_vm11, %v3007_v23 }
0x1242   :  { %2763 = vmatpush3.bf16.xpose.msk.msra.mxu1 %vm3425_vm11, %v3007_v23 }
0x1243   :  { %2766 = vmatprep.subr.msk.bf16.mxu1 %vm3425_vm11, %v3017_v26 }
0x124a   :  { %2769 = vmatpush3.bf16.xpose.msk.msra.mxu1 %vm3425_vm11, %v3017_v26 }
0x12e4   :  { %v2467_v39 = vpop.f32.mrb[18].mxu1 }
0x12e5   :  { %v1774_v40 = vadd.f32 %v2467_v39, %v1695_v44  ;;  %v1768_v29 = vpop.f32.mrb[19].mxu1 }
0x12e6   :  { %v1769_v27 = vadd.f32 %v1768_v29, %v1695_v44 }
0x12e7   :  { %v1778_v46 = vmul.f32 %v1774_v40, %v1774_v40 }
0x12e8   :  { %v1777_v47 = vmul.f32 %v1769_v27, %v1769_v27 }
0x12e9   :  { %v1780_v48 = vmul.f32 %v1778_v46, %v1774_v40 }
0x12ea   :  { %v1779_v49 = vmul.f32 %v1777_v47, %v1769_v27 }
0x12eb   :  { %v1782_v50 = vmul.f32 0.044715, %v1780_v48 }
0x12ec   :  { %v1781_v52 = vmul.f32 0.044715, %v1779_v49 }
0x12ed   :  { %v1784_v53 = vadd.f32 %v1782_v50, %v1774_v40 }
0x12ee   :  { %v1783_v37 = vadd.f32 %v1781_v52, %v1769_v27 }
0x12ef   :  { %v1786_v54 = vmul.f32 0.7978846, %v1784_v53 }
0x12f0   :  { %v1785_v55 = vmul.f32 0.7978846, %v1783_v37 }
0x12f1   :  { %2868 = vtanh.f32 %v1786_v54 }
0x12f2   :  { %2870 = vtanh.f32 %v1785_v55 }
0x12fb   :  { %v2869_v57 = vpop.eup %2868 }
0x12fc   :  { %v2871_v58 = vpop.eup %2870  ;;  %v1790_v28 = vadd.f32 1.0, %v2869_v57 }
0x12fd   :  { %v1789_v42 = vadd.f32 1.0, %v2871_v58 }
0x12fe   :  { %v1792_v25 = vmul.f32 0.5, %v1790_v28 }
0x12ff   :  { %v1791_v56 = vmul.f32 0.5, %v1789_v42 }
0x1300   :  { %v1794_v60 = vmul.f32 %v1792_v25, %v1774_v40 }
0x1301   :  { %v1793_v59 = vmul.f32 %v1791_v56, %v1769_v27 }
0x1303   :  { %2500 = vmatprep.mubr.f32.mxu0 %v1793_v59 }
0x1304   :  { %2501 = vmatmul.mubr.f32.vlgmr.msra.gmra.mrb[12].mxu0 %v1794_v60 }
0x13d7   :  { %v2502_v62 = vpop.f32.mrb[12].mxu0 }
0x13d8   :  { %v1871_v13 = vadd.f32 %v2502_v62, %v1798_v41  ;;  %v1865_v0 = vpop.f32.mrb[13].mxu0 }
0x13d9   :  { %v1866_v1 = vadd.f32 %v1865_v0, %v1798_v41 }
0x13da   :  { %v1875_v2 = vadd.f32 %v1871_v13, %v3361_v63 }
0x13db   :  { %v1874_v3 = vadd.f32 %v1866_v1, %v3357_v61 }
0x13dc   :  { %v1879_v4 = vsel %vm193_vm2, %v1875_v2, 0.0 }
0x13dd   :  { %1880 = vadd.xlane.f32.xlu0 %v1879_v4  ;;  %v1876_v5 = vsel %vm193_vm2, %v1874_v3, 0.0 }
0x13de   :  { %1877 = vadd.xlane.f32.xlu1 %v1876_v5 }
0x146a   :  { %v1881_v6 = vpop.xlane.xlu0 %1880 }
0x146b   :  { %v1883_v10 = vmul.f32 0.03125, %v1881_v6  ;;  %v1878_v11 = vpop.xlane.xlu1 %1877 }
0x146c   :  { %v1882_v14 = vmul.f32 0.03125, %v1878_v11 }
0x146d   :  { %v1885_v17 = vsub.f32 %v1875_v2, %v1883_v10 }
0x146e   :  { %v1884_v20 = vsub.f32 %v1874_v3, %v1882_v14 }
0x146f   :  { %v1887_v32 = vmul.f32 %v1885_v17, %v1885_v17 }
0x1470   :  { %v1886_v61 = vmul.f32 %v1884_v20, %v1884_v20 }
0x1471   :  { %v1891_v63 = vsel %vm193_vm2, %v1887_v32, 0.0 }
0x1472   :  { %1892 = vadd.xlane.f32.xlu0 %v1891_v63  ;;  %v1888_v23 = vsel %vm193_vm2, %v1886_v61, 0.0 }
0x1473   :  { %1889 = vadd.xlane.f32.xlu1 %v1888_v23 }
0x14ff   :  { %v1893_v15 = vpop.xlane.xlu0 %1892 }
0x1500   :  { %v1895_v12 = vmul.f32 0.03125, %v1893_v15  ;;  %v1890_v9 = vpop.xlane.xlu1 %1889 }
0x1501   :  { %v1894_v16 = vmul.f32 0.03125, %v1890_v9 }
0x1502   :  { %v1897_v18 = vadd.f32 1e-05, %v1895_v12 }
0x1503   :  { %v1896_v26 = vadd.f32 1e-05, %v1894_v16 }
0x1504   :  { %2872 = vrsqrt.f32 %v1897_v18 }
0x1505   :  { %2874 = vrsqrt.f32 %v1896_v26 }
0x150e   :  { %v2873_v21 = vpop.eup %2872 }
0x150f   :  { %v2875_v22 = vpop.eup %2874  ;;  %v1901_v24 = vmul.f32 %v2873_v21, %v1885_v17 }
0x1510   :  { %v1900_v45 = vmul.f32 %v2875_v22, %v1884_v20 }
0x1511   :  { %v1907_v33 = vmul.f32 %v1905_v19, %v1901_v24 }
0x1512   :  { %v1906_v34 = vmul.f32 %v1905_v19, %v1900_v45 }
0x1513   :  { %v1913_v38 = vadd.f32 %v1911_v31, %v1907_v33 }
0x1514   :  { %v1912_v36 = vadd.f32 %v1911_v31, %v1906_v34 }
0x1516   :  { %2535 = vmatprep.mubr.msk.f32.mxu1 %vm193_vm2, %v1912_v36 }
0x1517   :  { %2536 = vmatmul.mubr.msk.f32.vlgmr.msra.gmra.mrb[20].mxu1 %vm193_vm2, %v1913_v38 }
0x15ea   :  { %v2537_v35 = vpop.f32.mrb[20].mxu1 }
0x15eb   :  { %2044 = vst [vmem:[%s3502_s9 + $0x8] sm:$0xff] %v2537_v35  ;;  %v2034_v7 = vpop.f32.mrb[21].mxu1 }
0x15ec   :  { %2043 = vst [vmem:[%s3502_s9] sm:$0xff] %v2034_v7 }

</bundles_post_ra>
